<compile_context>
chip_gen: v7x
topology: tpu7x:2x2x1
jax: 0.10.0
libtpu: 0.0.40
codegen_flags: <defaults>
</compile_context>

<pallas_src>
import jax
import jax.numpy as jnp
from jax.experimental import pallas as pl
from jax.experimental.pallas import tpu as pltpu

# ----------------------------------------------------------------------------
# Module hyper-parameters (from MS_SSIM_L1_LOSS.__init__ defaults)
# ----------------------------------------------------------------------------
SIGMAS = (0.5, 1.0, 2.0, 4.0, 8.0)
CHANNEL = 3
DR = 255.0
C1 = (0.01 * DR) ** 2
C2 = (0.03 * DR) ** 2
ALPHA = 0.84
COMPENSATION = 200.0
FILTER_SIZE = int(4 * SIGMAS[-1] + 1)   # 33
PAD = int(2 * SIGMAS[-1])               # 16
N_SIGMAS = len(SIGMAS)                  # 5 (unique sigmas == unique conv mats)
N_MASKS = CHANNEL * N_SIGMAS            # 15

# Folded scalings: loss_mix = COMP*(ALPHA*(1-lM*PIcs) + (1-ALPHA)*(gl1/C)/DR)
MS_SCALE = COMPENSATION * ALPHA                            # weight of (1 - lM*PIcs)
L1_SCALE = COMPENSATION * (1.0 - ALPHA) / (DR * CHANNEL)   # weight of blur(sum|dx|)


def _build_cs_schedule():
    """Per input channel: tuple of (sigma_index, multiplicity) for the cs product.

    PyTorch grouped conv: mask m has sigma index m // CHANNEL and belongs to
    input-channel group m // N_SIGMAS.  Masks sharing (channel, sigma) produce
    bit-identical cs maps, so they are folded into powers: only 7 unique blur
    sets remain instead of 15.
    """
    sched = []
    for c in range(CHANNEL):
        counts = {}
        for m in range(N_SIGMAS * c, N_SIGMAS * (c + 1)):
            s = m // CHANNEL
            counts[s] = counts.get(s, 0) + 1
        sched.append(tuple(sorted(counts.items())))
    return tuple(sched)


# ((0,3),(1,2)) | ((1,1),(2,3),(3,1)) | ((3,2),(4,3))
CS_SCHEDULE = _build_cs_schedule()
# Masks 12..14 (last CHANNEL masks) all use the largest sigma; they drive both
# lM (= l^3) and the gaussian-weighted L1 term.
L_SIGMA_IDX = N_SIGMAS - 1


# ----------------------------------------------------------------------------
# Parameter construction (deterministic, plain-JAX glue)
# ----------------------------------------------------------------------------
def gauss_1d(size, sigma):
    coords = jnp.arange(size, dtype=jnp.float32) - size // 2
    g = jnp.exp(-(coords ** 2) / (2.0 * sigma ** 2))
    return g / jnp.sum(g)


def conv_matrix(g1d, n):
    """A[i, r] = g1d[r - i + PAD]; 'same' zero-padded conv == A @ X @ A^T.

    A is symmetric (symmetric Gaussian), so A^T == A bitwise.
    """
    i = jnp.arange(n)[:, None]
    r = jnp.arange(n)[None, :]
    u = r - i + PAD
    valid = (u >= 0) & (u < FILTER_SIZE)
    return jnp.where(valid, g1d[jnp.clip(u, 0, FILTER_SIZE - 1)], 0.0).astype(
        jnp.float32
    )


def build_conv_mats(h, w):
    """De-duplicated conv matrices: one per unique sigma (5), not per mask (15)."""
    g = [gauss_1d(FILTER_SIZE, s) for s in SIGMAS]
    ah = jnp.stack([conv_matrix(gi, h) for gi in g])   # (5, h, h)
    aw = jnp.stack([conv_matrix(gi, w) for gi in g])   # (5, w, w)
    return ah, aw


def _int_pow(v, n):
    out = v
    for _ in range(n - 1):
        out = out * v
    return out


# ----------------------------------------------------------------------------
# Pallas kernel: one batch element per grid step
# ----------------------------------------------------------------------------
def _ms_ssim_l1_kernel(x_ref, y_ref, ah_ref, aw_ref, out_ref):
    # x_ref, y_ref : (1, C, H, W)  original dtype (cast to f32 per channel here)
    # ah_ref       : (N_SIGMAS, H, H)  symmetric banded conv matrices
    # aw_ref       : (N_SIGMAS, W, W)
    # out_ref      : (1, 1, 1)         per-batch mean of loss_mix
    f32 = jnp.float32
    _, C, H, W = x_ref.shape

    pics = jnp.ones((H, W), f32)     # prod of cs over all 15 output channels
    lm = jnp.ones((H, W), f32)       # l[...,-1] * l[...,-2] * l[...,-3]
    dsum = jnp.zeros((H, W), f32)    # sum_c |x_c - y_c|  (for the L1 blur)

    for c in range(C):               # static unroll over the 3 input channels
        xc = x_ref[0, c].astype(f32)
        yc = y_ref[0, c].astype(f32)
        dsum = dsum + jnp.abs(xc - yc)

        # Batch the five blur inputs of this channel into one row-stacked
        # operand so stage A is a single (5H, W) @ (W, W) matmul per sigma.
        # Row stacking is sublane-aligned (H % 8 == 0) -> no lane relayout.
        stacked = jnp.concatenate(
            [xc, yc, xc * xc, yc * yc, xc * yc], axis=0)            # (5H, W)

        # Per-sigma loop: only (H, W) temporaries live at once (bounded VMEM).
        for sidx, power in CS_SCHEDULE[c]:
            a_h = ah_ref[sidx]                                      # (H, H)
            a_w = aw_ref[sidx]                                      # (W, W)

            # Stage A: right blur of all five inputs at once (A_w == A_w^T).
            t = jnp.dot(stacked, a_w, preferred_element_type=f32)   # (5H, W)
            # Stage B: left blur per input; row slices are sublane-aligned.
            mux = jnp.dot(a_h, t[0 * H:1 * H], preferred_element_type=f32)
            muy = jnp.dot(a_h, t[1 * H:2 * H], preferred_element_type=f32)
            exx = jnp.dot(a_h, t[2 * H:3 * H], preferred_element_type=f32)
            eyy = jnp.dot(a_h, t[3 * H:4 * H], preferred_element_type=f32)
            exy = jnp.dot(a_h, t[4 * H:5 * H], preferred_element_type=f32)

            mux2 = mux * mux
            muy2 = muy * muy
            muxy = mux * muy
            sigx2 = exx - mux2     # variance path stays f32 (cancellation)
            sigy2 = eyy - muy2
            sigxy = exy - muxy

            cs = (2.0 * sigxy + C2) * pl.reciprocal(
                sigx2 + sigy2 + C2, approx=True)
            pics = pics * _int_pow(cs, power)

            # lM only needs masks 12..14 -> (last channel, largest sigma).
            if c == C - 1 and sidx == L_SIGMA_IDX:
                l = (2.0 * muxy + C1) * pl.reciprocal(
                    mux2 + muy2 + C1, approx=True)
                lm = _int_pow(l, power)

    # Gaussian-weighted L1: masks 12..14 all use sigma=8, so by linearity one
    # blur of dsum replaces three blurs + channel mean (mean folded into
    # L1_SCALE).
    gl1 = jnp.dot(
        jnp.dot(ah_ref[L_SIGMA_IDX], dsum, preferred_element_type=f32),
        aw_ref[L_SIGMA_IDX],
        preferred_element_type=f32,
    )

    loss_map = MS_SCALE * (1.0 - lm * pics) + L1_SCALE * gl1
    out_ref[...] = jnp.mean(loss_map, keepdims=True)[None]          # (1, 1, 1)


def ms_ssim_l1_loss(x, y):
    """Pallas implementation of MS_SSIM_L1_LOSS.forward (channel=3 path)."""
    B, C, H, W = x.shape
    assert C == CHANNEL
    ah, aw = build_conv_mats(H, W)     # (5, H, H), (5, W, W) f32, de-duplicated

    # Explicit scoped-VMEM budget: double-buffered x/y blocks + conv tables +
    # headroom for the per-sigma (H, W) temporaries.
    itemsize = jnp.dtype(x.dtype).itemsize
    est = (2 * 2 * C * H * W * itemsize           # x, y blocks (double-buffered)
           + 2 * 4 * N_SIGMAS * (H * H + W * W)   # ah, aw (f32, double-buffered)
           + 4 * 40 * H * W)                      # live intermediates + slack
    vmem_limit = int(min(max(est, 32 * 1024 * 1024), 64 * 1024 * 1024))
    # TODO(synk): for H,W >= ~512 replace the dense (H,H)/(W,W) conv matrices
    # with banded, halo-tiled blocks (O(filter) MACs, resolution-independent
    # VMEM) and single-buffer the constant tables (pl.Buffered(1)).

    per_batch = pl.pallas_call(
        _ms_ssim_l1_kernel,
        out_shape=jax.ShapeDtypeStruct((B, 1, 1), jnp.float32),
        grid=(B,),
        in_specs=[
            pl.BlockSpec((1, C, H, W), lambda b: (b, 0, 0, 0)),
            pl.BlockSpec((1, C, H, W), lambda b: (b, 0, 0, 0)),
            # constant-index blocks: the pipeline skips the re-DMA on revisit
            pl.BlockSpec((N_SIGMAS, H, H), lambda b: (0, 0, 0)),
            pl.BlockSpec((N_SIGMAS, W, W), lambda b: (0, 0, 0)),
        ],
        out_specs=pl.BlockSpec((1, 1, 1), lambda b: (b, 0, 0)),
        compiler_params=pltpu.CompilerParams(
            dimension_semantics=("parallel",),   # independent batch -> megacore
            vmem_limit_bytes=vmem_limit,
        ),
    )(x, y, ah, aw)    # no host-side dtype cast: cast per channel in-kernel

    # tiny glue: mean over batch of per-batch spatial means == global mean
    return jnp.mean(per_batch)


# ----------------------------------------------------------------------------
# Pure-JAX reference (mirrors the PyTorch forward) for a correctness check
# ----------------------------------------------------------------------------
def reference_loss(x, y):
    g1d = jnp.stack([gauss_1d(FILTER_SIZE, s) for s in SIGMAS])        # (5, 33)
    m2d = jnp.einsum("si,sj->sij", g1d, g1d)                           # (5, 33, 33)
    sig_of_mask = jnp.array([m // CHANNEL for m in range(N_MASKS)])
    g_masks = m2d[sig_of_mask][:, None]                                # (15,1,33,33)

    def conv(img, w, groups):
        return jax.lax.conv_general_dilated(
            img, w, (1, 1), [(PAD, PAD), (PAD, PAD)],
            dimension_numbers=("NCHW", "OIHW", "NCHW"),
            feature_group_count=groups,
            precision=jax.lax.Precision.HIGHEST,
        )

    mux = conv(x, g_masks, CHANNEL)
    muy = conv(y, g_masks, CHANNEL)
    mux2, muy2, muxy = mux * mux, muy * muy, mux * muy
    sigmax2 = conv(x * x, g_masks, CHANNEL) - mux2
    sigmay2 = conv(y * y, g_masks, CHANNEL) - muy2
    sigmaxy = conv(x * y, g_masks, CHANNEL) - muxy
    l = (2 * muxy + C1) / (mux2 + muy2 + C1)
    cs = (2 * sigmaxy + C2) / (sigmax2 + sigmay2 + C2)
    lM = l[:, -1] * l[:, -2] * l[:, -3]
    PIcs = jnp.prod(cs, axis=1)
    loss_ms_ssim = 1.0 - lM * PIcs
    gl1 = conv(jnp.abs(x - y), g_masks[-CHANNEL:], CHANNEL).mean(axis=1)
    loss_mix = COMPENSATION * (ALPHA * loss_ms_ssim + (1 - ALPHA) * gl1 / DR)
    return jnp.mean(loss_mix)


if __name__ == "__main__":
    key = jax.random.PRNGKey(0)
    kx, ky = jax.random.split(key)
    B, C, H, W = 2, 3, 16, 16
    x = jax.random.uniform(kx, (B, C, H, W), jnp.float32, 0.0, 255.0)
    y = jax.random.uniform(ky, (B, C, H, W), jnp.float32, 0.0, 255.0)

    loss = jax.block_until_ready(ms_ssim_l1_loss(x, y))
    ref = jax.block_until_ready(reference_loss(x, y))

    assert jnp.isfinite(loss), loss
    err = abs(float(loss) - float(ref))
    assert err <= 2e-3 * max(1.0, abs(float(ref))), (float(loss), float(ref))
    print("KERNEL_OK")
</pallas_src>

<mosaic_0001>
module attributes {stable_mosaic.version = 11 : i64} {
  func.func @_ms_ssim_l1_kernel(%arg0: i32, %arg1: memref<1x3x16x16xf32, #tpu.memory_space<vmem>>, %arg2: memref<1x3x16x16xf32, #tpu.memory_space<vmem>>, %arg3: memref<5x16x16xf32, #tpu.memory_space<vmem>>, %arg4: memref<5x16x16xf32, #tpu.memory_space<vmem>>, %arg5: memref<1x1x1xf32, #tpu.memory_space<vmem>>) attributes {dimension_semantics = [#tpu.dimension_semantics<parallel>], iteration_bounds = array<i64: 2>, scalar_prefetch = 0 : i64, scratch_operands = 0 : i64, tpu.core_type = #tpu.core_type<tc>, window_params = [{transform_indices = @transform_0, window_bounds = array<i64: 1, 3, 16, 16>}, {transform_indices = @transform_1, window_bounds = array<i64: 1, 3, 16, 16>}, {pipeline_mode = #tpu.pipeline_mode<synchronous>, transform_indices = @transform_2, window_bounds = array<i64: 5, 16, 16>}, {pipeline_mode = #tpu.pipeline_mode<synchronous>, transform_indices = @transform_3, window_bounds = array<i64: 5, 16, 16>}, {transform_indices = @transform_4, window_bounds = array<i64: 1, 1, 1>}]} {
    %cst = arith.constant 1.000000e+00 : f32
    %0 = vector.broadcast %cst : f32 to vector<16x16xf32>
    %cst_0 = arith.constant 0.000000e+00 : f32
    %1 = vector.broadcast %cst_0 : f32 to vector<16x16xf32>
    %c0 = arith.constant 0 : index
    %c0_1 = arith.constant 0 : index
    %c0_2 = arith.constant 0 : index
    %c0_3 = arith.constant 0 : index
    %2 = vector.load %arg1[%c0, %c0_1, %c0_2, %c0_3] : memref<1x3x16x16xf32, #tpu.memory_space<vmem>>, vector<1x1x16x16xf32>
    %3 = vector.shape_cast %2 : vector<1x1x16x16xf32> to vector<16x16xf32>
    %c0_4 = arith.constant 0 : index
    %c0_5 = arith.constant 0 : index
    %c0_6 = arith.constant 0 : index
    %c0_7 = arith.constant 0 : index
    %4 = vector.load %arg2[%c0_4, %c0_5, %c0_6, %c0_7] : memref<1x3x16x16xf32, #tpu.memory_space<vmem>>, vector<1x1x16x16xf32>
    %5 = vector.shape_cast %4 : vector<1x1x16x16xf32> to vector<16x16xf32>
    %6 = arith.subf %3, %5 : vector<16x16xf32>
    %7 = math.absf %6 : vector<16x16xf32>
    %8 = arith.addf %1, %7 : vector<16x16xf32>
    %9 = arith.mulf %3, %3 : vector<16x16xf32>
    %10 = arith.mulf %5, %5 : vector<16x16xf32>
    %11 = arith.mulf %3, %5 : vector<16x16xf32>
    %12 = tpu.concatenate %3, %5, %9, %10, %11 in 0 : vector<16x16xf32>, vector<16x16xf32>, vector<16x16xf32>, vector<16x16xf32>, vector<16x16xf32> -> vector<80x16xf32>
    %c0_8 = arith.constant 0 : index
    %c0_9 = arith.constant 0 : index
    %c0_10 = arith.constant 0 : index
    %13 = vector.load %arg3[%c0_8, %c0_9, %c0_10] : memref<5x16x16xf32, #tpu.memory_space<vmem>>, vector<1x16x16xf32>
    %14 = vector.shape_cast %13 : vector<1x16x16xf32> to vector<16x16xf32>
    %c0_11 = arith.constant 0 : index
    %c0_12 = arith.constant 0 : index
    %c0_13 = arith.constant 0 : index
    %15 = vector.load %arg4[%c0_11, %c0_12, %c0_13] : memref<5x16x16xf32, #tpu.memory_space<vmem>>, vector<1x16x16xf32>
    %16 = vector.shape_cast %15 : vector<1x16x16xf32> to vector<16x16xf32>
    %cst_14 = arith.constant dense<0.000000e+00> : vector<80x16xf32>
    %17 = tpu.matmul %12, %16, %cst_14 {dimension_numbers = #tpu.dot_dimension_numbers<[1], [0], [0], [1], [0, 0, 1, 1], [], []>} : vector<80x16xf32>, vector<16x16xf32>, vector<80x16xf32> -> vector<80x16xf32>
    %18 = vector.extract_strided_slice %17 {offsets = [0, 0], sizes = [16, 16], strides = [1, 1]} : vector<80x16xf32> to vector<16x16xf32>
    %cst_15 = arith.constant dense<0.000000e+00> : vector<16x16xf32>
    %19 = tpu.matmul %14, %18, %cst_15 {dimension_numbers = #tpu.dot_dimension_numbers<[1], [0], [0], [1], [0, 0, 1, 1], [], []>} : vector<16x16xf32>, vector<16x16xf32>, vector<16x16xf32> -> vector<16x16xf32>
    %20 = vector.extract_strided_slice %17 {offsets = [16, 0], sizes = [16, 16], strides = [1, 1]} : vector<80x16xf32> to vector<16x16xf32>
    %cst_16 = arith.constant dense<0.000000e+00> : vector<16x16xf32>
    %21 = tpu.matmul %14, %20, %cst_16 {dimension_numbers = #tpu.dot_dimension_numbers<[1], [0], [0], [1], [0, 0, 1, 1], [], []>} : vector<16x16xf32>, vector<16x16xf32>, vector<16x16xf32> -> vector<16x16xf32>
    %22 = vector.extract_strided_slice %17 {offsets = [32, 0], sizes = [16, 16], strides = [1, 1]} : vector<80x16xf32> to vector<16x16xf32>
    %cst_17 = arith.constant dense<0.000000e+00> : vector<16x16xf32>
    %23 = tpu.matmul %14, %22, %cst_17 {dimension_numbers = #tpu.dot_dimension_numbers<[1], [0], [0], [1], [0, 0, 1, 1], [], []>} : vector<16x16xf32>, vector<16x16xf32>, vector<16x16xf32> -> vector<16x16xf32>
    %24 = vector.extract_strided_slice %17 {offsets = [48, 0], sizes = [16, 16], strides = [1, 1]} : vector<80x16xf32> to vector<16x16xf32>
    %cst_18 = arith.constant dense<0.000000e+00> : vector<16x16xf32>
    %25 = tpu.matmul %14, %24, %cst_18 {dimension_numbers = #tpu.dot_dimension_numbers<[1], [0], [0], [1], [0, 0, 1, 1], [], []>} : vector<16x16xf32>, vector<16x16xf32>, vector<16x16xf32> -> vector<16x16xf32>
    %26 = vector.extract_strided_slice %17 {offsets = [64, 0], sizes = [16, 16], strides = [1, 1]} : vector<80x16xf32> to vector<16x16xf32>
    %cst_19 = arith.constant dense<0.000000e+00> : vector<16x16xf32>
    %27 = tpu.matmul %14, %26, %cst_19 {dimension_numbers = #tpu.dot_dimension_numbers<[1], [0], [0], [1], [0, 0, 1, 1], [], []>} : vector<16x16xf32>, vector<16x16xf32>, vector<16x16xf32> -> vector<16x16xf32>
    %28 = arith.mulf %19, %19 : vector<16x16xf32>
    %29 = arith.mulf %21, %21 : vector<16x16xf32>
    %30 = arith.mulf %19, %21 : vector<16x16xf32>
    %31 = arith.subf %23, %28 : vector<16x16xf32>
    %32 = arith.subf %25, %29 : vector<16x16xf32>
    %33 = arith.subf %27, %30 : vector<16x16xf32>
    %cst_20 = arith.constant 2.000000e+00 : f32
    %34 = vector.broadcast %cst_20 : f32 to vector<16x16xf32>
    %35 = arith.mulf %34, %33 : vector<16x16xf32>
    %cst_21 = arith.constant 5.852250e+01 : f32
    %36 = vector.broadcast %cst_21 : f32 to vector<16x16xf32>
    %37 = arith.addf %35, %36 : vector<16x16xf32>
    %38 = arith.addf %31, %32 : vector<16x16xf32>
    %cst_22 = arith.constant 5.852250e+01 : f32
    %39 = vector.broadcast %cst_22 : f32 to vector<16x16xf32>
    %40 = arith.addf %38, %39 : vector<16x16xf32>
    %41 = tpu.reciprocal %40 {approx = true} : vector<16x16xf32> -> vector<16x16xf32>
    %42 = arith.mulf %37, %41 : vector<16x16xf32>
    %43 = arith.mulf %42, %42 : vector<16x16xf32>
    %44 = arith.mulf %43, %42 : vector<16x16xf32>
    %45 = arith.mulf %0, %44 : vector<16x16xf32>
    %c1 = arith.constant 1 : index
    %c0_23 = arith.constant 0 : index
    %c0_24 = arith.constant 0 : index
    %46 = vector.load %arg3[%c1, %c0_23, %c0_24] : memref<5x16x16xf32, #tpu.memory_space<vmem>>, vector<1x16x16xf32>
    %47 = vector.shape_cast %46 : vector<1x16x16xf32> to vector<16x16xf32>
    %c1_25 = arith.constant 1 : index
    %c0_26 = arith.constant 0 : index
    %c0_27 = arith.constant 0 : index
    %48 = vector.load %arg4[%c1_25, %c0_26, %c0_27] : memref<5x16x16xf32, #tpu.memory_space<vmem>>, vector<1x16x16xf32>
    %49 = vector.shape_cast %48 : vector<1x16x16xf32> to vector<16x16xf32>
    %cst_28 = arith.constant dense<0.000000e+00> : vector<80x16xf32>
    %50 = tpu.matmul %12, %49, %cst_28 {dimension_numbers = #tpu.dot_dimension_numbers<[1], [0], [0], [1], [0, 0, 1, 1], [], []>} : vector<80x16xf32>, vector<16x16xf32>, vector<80x16xf32> -> vector<80x16xf32>
    %51 = vector.extract_strided_slice %50 {offsets = [0, 0], sizes = [16, 16], strides = [1, 1]} : vector<80x16xf32> to vector<16x16xf32>
    %cst_29 = arith.constant dense<0.000000e+00> : vector<16x16xf32>
    %52 = tpu.matmul %47, %51, %cst_29 {dimension_numbers = #tpu.dot_dimension_numbers<[1], [0], [0], [1], [0, 0, 1, 1], [], []>} : vector<16x16xf32>, vector<16x16xf32>, vector<16x16xf32> -> vector<16x16xf32>
    %53 = vector.extract_strided_slice %50 {offsets = [16, 0], sizes = [16, 16], strides = [1, 1]} : vector<80x16xf32> to vector<16x16xf32>
    %cst_30 = arith.constant dense<0.000000e+00> : vector<16x16xf32>
    %54 = tpu.matmul %47, %53, %cst_30 {dimension_numbers = #tpu.dot_dimension_numbers<[1], [0], [0], [1], [0, 0, 1, 1], [], []>} : vector<16x16xf32>, vector<16x16xf32>, vector<16x16xf32> -> vector<16x16xf32>
    %55 = vector.extract_strided_slice %50 {offsets = [32, 0], sizes = [16, 16], strides = [1, 1]} : vector<80x16xf32> to vector<16x16xf32>
    %cst_31 = arith.constant dense<0.000000e+00> : vector<16x16xf32>
    %56 = tpu.matmul %47, %55, %cst_31 {dimension_numbers = #tpu.dot_dimension_numbers<[1], [0], [0], [1], [0, 0, 1, 1], [], []>} : vector<16x16xf32>, vector<16x16xf32>, vector<16x16xf32> -> vector<16x16xf32>
    %57 = vector.extract_strided_slice %50 {offsets = [48, 0], sizes = [16, 16], strides = [1, 1]} : vector<80x16xf32> to vector<16x16xf32>
    %cst_32 = arith.constant dense<0.000000e+00> : vector<16x16xf32>
    %58 = tpu.matmul %47, %57, %cst_32 {dimension_numbers = #tpu.dot_dimension_numbers<[1], [0], [0], [1], [0, 0, 1, 1], [], []>} : vector<16x16xf32>, vector<16x16xf32>, vector<16x16xf32> -> vector<16x16xf32>
    %59 = vector.extract_strided_slice %50 {offsets = [64, 0], sizes = [16, 16], strides = [1, 1]} : vector<80x16xf32> to vector<16x16xf32>
    %cst_33 = arith.constant dense<0.000000e+00> : vector<16x16xf32>
    %60 = tpu.matmul %47, %59, %cst_33 {dimension_numbers = #tpu.dot_dimension_numbers<[1], [0], [0], [1], [0, 0, 1, 1], [], []>} : vector<16x16xf32>, vector<16x16xf32>, vector<16x16xf32> -> vector<16x16xf32>
    %61 = arith.mulf %52, %52 : vector<16x16xf32>
    %62 = arith.mulf %54, %54 : vector<16x16xf32>
    %63 = arith.mulf %52, %54 : vector<16x16xf32>
    %64 = arith.subf %56, %61 : vector<16x16xf32>
    %65 = arith.subf %58, %62 : vector<16x16xf32>
    %66 = arith.subf %60, %63 : vector<16x16xf32>
    %cst_34 = arith.constant 2.000000e+00 : f32
    %67 = vector.broadcast %cst_34 : f32 to vector<16x16xf32>
    %68 = arith.mulf %67, %66 : vector<16x16xf32>
    %cst_35 = arith.constant 5.852250e+01 : f32
    %69 = vector.broadcast %cst_35 : f32 to vector<16x16xf32>
    %70 = arith.addf %68, %69 : vector<16x16xf32>
    %71 = arith.addf %64, %65 : vector<16x16xf32>
    %cst_36 = arith.constant 5.852250e+01 : f32
    %72 = vector.broadcast %cst_36 : f32 to vector<16x16xf32>
    %73 = arith.addf %71, %72 : vector<16x16xf32>
    %74 = tpu.reciprocal %73 {approx = true} : vector<16x16xf32> -> vector<16x16xf32>
    %75 = arith.mulf %70, %74 : vector<16x16xf32>
    %76 = arith.mulf %75, %75 : vector<16x16xf32>
    %77 = arith.mulf %45, %76 : vector<16x16xf32>
    %c0_37 = arith.constant 0 : index
    %c1_38 = arith.constant 1 : index
    %c0_39 = arith.constant 0 : index
    %c0_40 = arith.constant 0 : index
    %78 = vector.load %arg1[%c0_37, %c1_38, %c0_39, %c0_40] : memref<1x3x16x16xf32, #tpu.memory_space<vmem>>, vector<1x1x16x16xf32>
    %79 = vector.shape_cast %78 : vector<1x1x16x16xf32> to vector<16x16xf32>
    %c0_41 = arith.constant 0 : index
    %c1_42 = arith.constant 1 : index
    %c0_43 = arith.constant 0 : index
    %c0_44 = arith.constant 0 : index
    %80 = vector.load %arg2[%c0_41, %c1_42, %c0_43, %c0_44] : memref<1x3x16x16xf32, #tpu.memory_space<vmem>>, vector<1x1x16x16xf32>
    %81 = vector.shape_cast %80 : vector<1x1x16x16xf32> to vector<16x16xf32>
    %82 = arith.subf %79, %81 : vector<16x16xf32>
    %83 = math.absf %82 : vector<16x16xf32>
    %84 = arith.addf %8, %83 : vector<16x16xf32>
    %85 = arith.mulf %79, %79 : vector<16x16xf32>
    %86 = arith.mulf %81, %81 : vector<16x16xf32>
    %87 = arith.mulf %79, %81 : vector<16x16xf32>
    %88 = tpu.concatenate %79, %81, %85, %86, %87 in 0 : vector<16x16xf32>, vector<16x16xf32>, vector<16x16xf32>, vector<16x16xf32>, vector<16x16xf32> -> vector<80x16xf32>
    %c1_45 = arith.constant 1 : index
    %c0_46 = arith.constant 0 : index
    %c0_47 = arith.constant 0 : index
    %89 = vector.load %arg3[%c1_45, %c0_46, %c0_47] : memref<5x16x16xf32, #tpu.memory_space<vmem>>, vector<1x16x16xf32>
    %90 = vector.shape_cast %89 : vector<1x16x16xf32> to vector<16x16xf32>
    %c1_48 = arith.constant 1 : index
    %c0_49 = arith.constant 0 : index
    %c0_50 = arith.constant 0 : index
    %91 = vector.load %arg4[%c1_48, %c0_49, %c0_50] : memref<5x16x16xf32, #tpu.memory_space<vmem>>, vector<1x16x16xf32>
    %92 = vector.shape_cast %91 : vector<1x16x16xf32> to vector<16x16xf32>
    %cst_51 = arith.constant dense<0.000000e+00> : vector<80x16xf32>
    %93 = tpu.matmul %88, %92, %cst_51 {dimension_numbers = #tpu.dot_dimension_numbers<[1], [0], [0], [1], [0, 0, 1, 1], [], []>} : vector<80x16xf32>, vector<16x16xf32>, vector<80x16xf32> -> vector<80x16xf32>
    %94 = vector.extract_strided_slice %93 {offsets = [0, 0], sizes = [16, 16], strides = [1, 1]} : vector<80x16xf32> to vector<16x16xf32>
    %cst_52 = arith.constant dense<0.000000e+00> : vector<16x16xf32>
    %95 = tpu.matmul %90, %94, %cst_52 {dimension_numbers = #tpu.dot_dimension_numbers<[1], [0], [0], [1], [0, 0, 1, 1], [], []>} : vector<16x16xf32>, vector<16x16xf32>, vector<16x16xf32> -> vector<16x16xf32>
    %96 = vector.extract_strided_slice %93 {offsets = [16, 0], sizes = [16, 16], strides = [1, 1]} : vector<80x16xf32> to vector<16x16xf32>
    %cst_53 = arith.constant dense<0.000000e+00> : vector<16x16xf32>
    %97 = tpu.matmul %90, %96, %cst_53 {dimension_numbers = #tpu.dot_dimension_numbers<[1], [0], [0], [1], [0, 0, 1, 1], [], []>} : vector<16x16xf32>, vector<16x16xf32>, vector<16x16xf32> -> vector<16x16xf32>
    %98 = vector.extract_strided_slice %93 {offsets = [32, 0], sizes = [16, 16], strides = [1, 1]} : vector<80x16xf32> to vector<16x16xf32>
    %cst_54 = arith.constant dense<0.000000e+00> : vector<16x16xf32>
    %99 = tpu.matmul %90, %98, %cst_54 {dimension_numbers = #tpu.dot_dimension_numbers<[1], [0], [0], [1], [0, 0, 1, 1], [], []>} : vector<16x16xf32>, vector<16x16xf32>, vector<16x16xf32> -> vector<16x16xf32>
    %100 = vector.extract_strided_slice %93 {offsets = [48, 0], sizes = [16, 16], strides = [1, 1]} : vector<80x16xf32> to vector<16x16xf32>
    %cst_55 = arith.constant dense<0.000000e+00> : vector<16x16xf32>
    %101 = tpu.matmul %90, %100, %cst_55 {dimension_numbers = #tpu.dot_dimension_numbers<[1], [0], [0], [1], [0, 0, 1, 1], [], []>} : vector<16x16xf32>, vector<16x16xf32>, vector<16x16xf32> -> vector<16x16xf32>
    %102 = vector.extract_strided_slice %93 {offsets = [64, 0], sizes = [16, 16], strides = [1, 1]} : vector<80x16xf32> to vector<16x16xf32>
    %cst_56 = arith.constant dense<0.000000e+00> : vector<16x16xf32>
    %103 = tpu.matmul %90, %102, %cst_56 {dimension_numbers = #tpu.dot_dimension_numbers<[1], [0], [0], [1], [0, 0, 1, 1], [], []>} : vector<16x16xf32>, vector<16x16xf32>, vector<16x16xf32> -> vector<16x16xf32>
    %104 = arith.mulf %95, %95 : vector<16x16xf32>
    %105 = arith.mulf %97, %97 : vector<16x16xf32>
    %106 = arith.mulf %95, %97 : vector<16x16xf32>
    %107 = arith.subf %99, %104 : vector<16x16xf32>
    %108 = arith.subf %101, %105 : vector<16x16xf32>
    %109 = arith.subf %103, %106 : vector<16x16xf32>
    %cst_57 = arith.constant 2.000000e+00 : f32
    %110 = vector.broadcast %cst_57 : f32 to vector<16x16xf32>
    %111 = arith.mulf %110, %109 : vector<16x16xf32>
    %cst_58 = arith.constant 5.852250e+01 : f32
    %112 = vector.broadcast %cst_58 : f32 to vector<16x16xf32>
    %113 = arith.addf %111, %112 : vector<16x16xf32>
    %114 = arith.addf %107, %108 : vector<16x16xf32>
    %cst_59 = arith.constant 5.852250e+01 : f32
    %115 = vector.broadcast %cst_59 : f32 to vector<16x16xf32>
    %116 = arith.addf %114, %115 : vector<16x16xf32>
    %117 = tpu.reciprocal %116 {approx = true} : vector<16x16xf32> -> vector<16x16xf32>
    %118 = arith.mulf %113, %117 : vector<16x16xf32>
    %119 = arith.mulf %77, %118 : vector<16x16xf32>
    %c2 = arith.constant 2 : index
    %c0_60 = arith.constant 0 : index
    %c0_61 = arith.constant 0 : index
    %120 = vector.load %arg3[%c2, %c0_60, %c0_61] : memref<5x16x16xf32, #tpu.memory_space<vmem>>, vector<1x16x16xf32>
    %121 = vector.shape_cast %120 : vector<1x16x16xf32> to vector<16x16xf32>
    %c2_62 = arith.constant 2 : index
    %c0_63 = arith.constant 0 : index
    %c0_64 = arith.constant 0 : index
    %122 = vector.load %arg4[%c2_62, %c0_63, %c0_64] : memref<5x16x16xf32, #tpu.memory_space<vmem>>, vector<1x16x16xf32>
    %123 = vector.shape_cast %122 : vector<1x16x16xf32> to vector<16x16xf32>
    %cst_65 = arith.constant dense<0.000000e+00> : vector<80x16xf32>
    %124 = tpu.matmul %88, %123, %cst_65 {dimension_numbers = #tpu.dot_dimension_numbers<[1], [0], [0], [1], [0, 0, 1, 1], [], []>} : vector<80x16xf32>, vector<16x16xf32>, vector<80x16xf32> -> vector<80x16xf32>
    %125 = vector.extract_strided_slice %124 {offsets = [0, 0], sizes = [16, 16], strides = [1, 1]} : vector<80x16xf32> to vector<16x16xf32>
    %cst_66 = arith.constant dense<0.000000e+00> : vector<16x16xf32>
    %126 = tpu.matmul %121, %125, %cst_66 {dimension_numbers = #tpu.dot_dimension_numbers<[1], [0], [0], [1], [0, 0, 1, 1], [], []>} : vector<16x16xf32>, vector<16x16xf32>, vector<16x16xf32> -> vector<16x16xf32>
    %127 = vector.extract_strided_slice %124 {offsets = [16, 0], sizes = [16, 16], strides = [1, 1]} : vector<80x16xf32> to vector<16x16xf32>
    %cst_67 = arith.constant dense<0.000000e+00> : vector<16x16xf32>
    %128 = tpu.matmul %121, %127, %cst_67 {dimension_numbers = #tpu.dot_dimension_numbers<[1], [0], [0], [1], [0, 0, 1, 1], [], []>} : vector<16x16xf32>, vector<16x16xf32>, vector<16x16xf32> -> vector<16x16xf32>
    %129 = vector.extract_strided_slice %124 {offsets = [32, 0], sizes = [16, 16], strides = [1, 1]} : vector<80x16xf32> to vector<16x16xf32>
    %cst_68 = arith.constant dense<0.000000e+00> : vector<16x16xf32>
    %130 = tpu.matmul %121, %129, %cst_68 {dimension_numbers = #tpu.dot_dimension_numbers<[1], [0], [0], [1], [0, 0, 1, 1], [], []>} : vector<16x16xf32>, vector<16x16xf32>, vector<16x16xf32> -> vector<16x16xf32>
    %131 = vector.extract_strided_slice %124 {offsets = [48, 0], sizes = [16, 16], strides = [1, 1]} : vector<80x16xf32> to vector<16x16xf32>
    %cst_69 = arith.constant dense<0.000000e+00> : vector<16x16xf32>
    %132 = tpu.matmul %121, %131, %cst_69 {dimension_numbers = #tpu.dot_dimension_numbers<[1], [0], [0], [1], [0, 0, 1, 1], [], []>} : vector<16x16xf32>, vector<16x16xf32>, vector<16x16xf32> -> vector<16x16xf32>
    %133 = vector.extract_strided_slice %124 {offsets = [64, 0], sizes = [16, 16], strides = [1, 1]} : vector<80x16xf32> to vector<16x16xf32>
    %cst_70 = arith.constant dense<0.000000e+00> : vector<16x16xf32>
    %134 = tpu.matmul %121, %133, %cst_70 {dimension_numbers = #tpu.dot_dimension_numbers<[1], [0], [0], [1], [0, 0, 1, 1], [], []>} : vector<16x16xf32>, vector<16x16xf32>, vector<16x16xf32> -> vector<16x16xf32>
    %135 = arith.mulf %126, %126 : vector<16x16xf32>
    %136 = arith.mulf %128, %128 : vector<16x16xf32>
    %137 = arith.mulf %126, %128 : vector<16x16xf32>
    %138 = arith.subf %130, %135 : vector<16x16xf32>
    %139 = arith.subf %132, %136 : vector<16x16xf32>
    %140 = arith.subf %134, %137 : vector<16x16xf32>
    %cst_71 = arith.constant 2.000000e+00 : f32
    %141 = vector.broadcast %cst_71 : f32 to vector<16x16xf32>
    %142 = arith.mulf %141, %140 : vector<16x16xf32>
    %cst_72 = arith.constant 5.852250e+01 : f32
    %143 = vector.broadcast %cst_72 : f32 to vector<16x16xf32>
    %144 = arith.addf %142, %143 : vector<16x16xf32>
    %145 = arith.addf %138, %139 : vector<16x16xf32>
    %cst_73 = arith.constant 5.852250e+01 : f32
    %146 = vector.broadcast %cst_73 : f32 to vector<16x16xf32>
    %147 = arith.addf %145, %146 : vector<16x16xf32>
    %148 = tpu.reciprocal %147 {approx = true} : vector<16x16xf32> -> vector<16x16xf32>
    %149 = arith.mulf %144, %148 : vector<16x16xf32>
    %150 = arith.mulf %149, %149 : vector<16x16xf32>
    %151 = arith.mulf %150, %149 : vector<16x16xf32>
    %152 = arith.mulf %119, %151 : vector<16x16xf32>
    %c3 = arith.constant 3 : index
    %c0_74 = arith.constant 0 : index
    %c0_75 = arith.constant 0 : index
    %153 = vector.load %arg3[%c3, %c0_74, %c0_75] : memref<5x16x16xf32, #tpu.memory_space<vmem>>, vector<1x16x16xf32>
    %154 = vector.shape_cast %153 : vector<1x16x16xf32> to vector<16x16xf32>
    %c3_76 = arith.constant 3 : index
    %c0_77 = arith.constant 0 : index
    %c0_78 = arith.constant 0 : index
    %155 = vector.load %arg4[%c3_76, %c0_77, %c0_78] : memref<5x16x16xf32, #tpu.memory_space<vmem>>, vector<1x16x16xf32>
    %156 = vector.shape_cast %155 : vector<1x16x16xf32> to vector<16x16xf32>
    %cst_79 = arith.constant dense<0.000000e+00> : vector<80x16xf32>
    %157 = tpu.matmul %88, %156, %cst_79 {dimension_numbers = #tpu.dot_dimension_numbers<[1], [0], [0], [1], [0, 0, 1, 1], [], []>} : vector<80x16xf32>, vector<16x16xf32>, vector<80x16xf32> -> vector<80x16xf32>
    %158 = vector.extract_strided_slice %157 {offsets = [0, 0], sizes = [16, 16], strides = [1, 1]} : vector<80x16xf32> to vector<16x16xf32>
    %cst_80 = arith.constant dense<0.000000e+00> : vector<16x16xf32>
    %159 = tpu.matmul %154, %158, %cst_80 {dimension_numbers = #tpu.dot_dimension_numbers<[1], [0], [0], [1], [0, 0, 1, 1], [], []>} : vector<16x16xf32>, vector<16x16xf32>, vector<16x16xf32> -> vector<16x16xf32>
    %160 = vector.extract_strided_slice %157 {offsets = [16, 0], sizes = [16, 16], strides = [1, 1]} : vector<80x16xf32> to vector<16x16xf32>
    %cst_81 = arith.constant dense<0.000000e+00> : vector<16x16xf32>
    %161 = tpu.matmul %154, %160, %cst_81 {dimension_numbers = #tpu.dot_dimension_numbers<[1], [0], [0], [1], [0, 0, 1, 1], [], []>} : vector<16x16xf32>, vector<16x16xf32>, vector<16x16xf32> -> vector<16x16xf32>
    %162 = vector.extract_strided_slice %157 {offsets = [32, 0], sizes = [16, 16], strides = [1, 1]} : vector<80x16xf32> to vector<16x16xf32>
    %cst_82 = arith.constant dense<0.000000e+00> : vector<16x16xf32>
    %163 = tpu.matmul %154, %162, %cst_82 {dimension_numbers = #tpu.dot_dimension_numbers<[1], [0], [0], [1], [0, 0, 1, 1], [], []>} : vector<16x16xf32>, vector<16x16xf32>, vector<16x16xf32> -> vector<16x16xf32>
    %164 = vector.extract_strided_slice %157 {offsets = [48, 0], sizes = [16, 16], strides = [1, 1]} : vector<80x16xf32> to vector<16x16xf32>
    %cst_83 = arith.constant dense<0.000000e+00> : vector<16x16xf32>
    %165 = tpu.matmul %154, %164, %cst_83 {dimension_numbers = #tpu.dot_dimension_numbers<[1], [0], [0], [1], [0, 0, 1, 1], [], []>} : vector<16x16xf32>, vector<16x16xf32>, vector<16x16xf32> -> vector<16x16xf32>
    %166 = vector.extract_strided_slice %157 {offsets = [64, 0], sizes = [16, 16], strides = [1, 1]} : vector<80x16xf32> to vector<16x16xf32>
    %cst_84 = arith.constant dense<0.000000e+00> : vector<16x16xf32>
    %167 = tpu.matmul %154, %166, %cst_84 {dimension_numbers = #tpu.dot_dimension_numbers<[1], [0], [0], [1], [0, 0, 1, 1], [], []>} : vector<16x16xf32>, vector<16x16xf32>, vector<16x16xf32> -> vector<16x16xf32>
    %168 = arith.mulf %159, %159 : vector<16x16xf32>
    %169 = arith.mulf %161, %161 : vector<16x16xf32>
    %170 = arith.mulf %159, %161 : vector<16x16xf32>
    %171 = arith.subf %163, %168 : vector<16x16xf32>
    %172 = arith.subf %165, %169 : vector<16x16xf32>
    %173 = arith.subf %167, %170 : vector<16x16xf32>
    %cst_85 = arith.constant 2.000000e+00 : f32
    %174 = vector.broadcast %cst_85 : f32 to vector<16x16xf32>
    %175 = arith.mulf %174, %173 : vector<16x16xf32>
    %cst_86 = arith.constant 5.852250e+01 : f32
    %176 = vector.broadcast %cst_86 : f32 to vector<16x16xf32>
    %177 = arith.addf %175, %176 : vector<16x16xf32>
    %178 = arith.addf %171, %172 : vector<16x16xf32>
    %cst_87 = arith.constant 5.852250e+01 : f32
    %179 = vector.broadcast %cst_87 : f32 to vector<16x16xf32>
    %180 = arith.addf %178, %179 : vector<16x16xf32>
    %181 = tpu.reciprocal %180 {approx = true} : vector<16x16xf32> -> vector<16x16xf32>
    %182 = arith.mulf %177, %181 : vector<16x16xf32>
    %183 = arith.mulf %152, %182 : vector<16x16xf32>
    %c0_88 = arith.constant 0 : index
    %c2_89 = arith.constant 2 : index
    %c0_90 = arith.constant 0 : index
    %c0_91 = arith.constant 0 : index
    %184 = vector.load %arg1[%c0_88, %c2_89, %c0_90, %c0_91] : memref<1x3x16x16xf32, #tpu.memory_space<vmem>>, vector<1x1x16x16xf32>
    %185 = vector.shape_cast %184 : vector<1x1x16x16xf32> to vector<16x16xf32>
    %c0_92 = arith.constant 0 : index
    %c2_93 = arith.constant 2 : index
    %c0_94 = arith.constant 0 : index
    %c0_95 = arith.constant 0 : index
    %186 = vector.load %arg2[%c0_92, %c2_93, %c0_94, %c0_95] : memref<1x3x16x16xf32, #tpu.memory_space<vmem>>, vector<1x1x16x16xf32>
    %187 = vector.shape_cast %186 : vector<1x1x16x16xf32> to vector<16x16xf32>
    %188 = arith.subf %185, %187 : vector<16x16xf32>
    %189 = math.absf %188 : vector<16x16xf32>
    %190 = arith.addf %84, %189 : vector<16x16xf32>
    %191 = arith.mulf %185, %185 : vector<16x16xf32>
    %192 = arith.mulf %187, %187 : vector<16x16xf32>
    %193 = arith.mulf %185, %187 : vector<16x16xf32>
    %194 = tpu.concatenate %185, %187, %191, %192, %193 in 0 : vector<16x16xf32>, vector<16x16xf32>, vector<16x16xf32>, vector<16x16xf32>, vector<16x16xf32> -> vector<80x16xf32>
    %c3_96 = arith.constant 3 : index
    %c0_97 = arith.constant 0 : index
    %c0_98 = arith.constant 0 : index
    %195 = vector.load %arg3[%c3_96, %c0_97, %c0_98] : memref<5x16x16xf32, #tpu.memory_space<vmem>>, vector<1x16x16xf32>
    %196 = vector.shape_cast %195 : vector<1x16x16xf32> to vector<16x16xf32>
    %c3_99 = arith.constant 3 : index
    %c0_100 = arith.constant 0 : index
    %c0_101 = arith.constant 0 : index
    %197 = vector.load %arg4[%c3_99, %c0_100, %c0_101] : memref<5x16x16xf32, #tpu.memory_space<vmem>>, vector<1x16x16xf32>
    %198 = vector.shape_cast %197 : vector<1x16x16xf32> to vector<16x16xf32>
    %cst_102 = arith.constant dense<0.000000e+00> : vector<80x16xf32>
    %199 = tpu.matmul %194, %198, %cst_102 {dimension_numbers = #tpu.dot_dimension_numbers<[1], [0], [0], [1], [0, 0, 1, 1], [], []>} : vector<80x16xf32>, vector<16x16xf32>, vector<80x16xf32> -> vector<80x16xf32>
    %200 = vector.extract_strided_slice %199 {offsets = [0, 0], sizes = [16, 16], strides = [1, 1]} : vector<80x16xf32> to vector<16x16xf32>
    %cst_103 = arith.constant dense<0.000000e+00> : vector<16x16xf32>
    %201 = tpu.matmul %196, %200, %cst_103 {dimension_numbers = #tpu.dot_dimension_numbers<[1], [0], [0], [1], [0, 0, 1, 1], [], []>} : vector<16x16xf32>, vector<16x16xf32>, vector<16x16xf32> -> vector<16x16xf32>
    %202 = vector.extract_strided_slice %199 {offsets = [16, 0], sizes = [16, 16], strides = [1, 1]} : vector<80x16xf32> to vector<16x16xf32>
    %cst_104 = arith.constant dense<0.000000e+00> : vector<16x16xf32>
    %203 = tpu.matmul %196, %202, %cst_104 {dimension_numbers = #tpu.dot_dimension_numbers<[1], [0], [0], [1], [0, 0, 1, 1], [], []>} : vector<16x16xf32>, vector<16x16xf32>, vector<16x16xf32> -> vector<16x16xf32>
    %204 = vector.extract_strided_slice %199 {offsets = [32, 0], sizes = [16, 16], strides = [1, 1]} : vector<80x16xf32> to vector<16x16xf32>
    %cst_105 = arith.constant dense<0.000000e+00> : vector<16x16xf32>
    %205 = tpu.matmul %196, %204, %cst_105 {dimension_numbers = #tpu.dot_dimension_numbers<[1], [0], [0], [1], [0, 0, 1, 1], [], []>} : vector<16x16xf32>, vector<16x16xf32>, vector<16x16xf32> -> vector<16x16xf32>
    %206 = vector.extract_strided_slice %199 {offsets = [48, 0], sizes = [16, 16], strides = [1, 1]} : vector<80x16xf32> to vector<16x16xf32>
    %cst_106 = arith.constant dense<0.000000e+00> : vector<16x16xf32>
    %207 = tpu.matmul %196, %206, %cst_106 {dimension_numbers = #tpu.dot_dimension_numbers<[1], [0], [0], [1], [0, 0, 1, 1], [], []>} : vector<16x16xf32>, vector<16x16xf32>, vector<16x16xf32> -> vector<16x16xf32>
    %208 = vector.extract_strided_slice %199 {offsets = [64, 0], sizes = [16, 16], strides = [1, 1]} : vector<80x16xf32> to vector<16x16xf32>
    %cst_107 = arith.constant dense<0.000000e+00> : vector<16x16xf32>
    %209 = tpu.matmul %196, %208, %cst_107 {dimension_numbers = #tpu.dot_dimension_numbers<[1], [0], [0], [1], [0, 0, 1, 1], [], []>} : vector<16x16xf32>, vector<16x16xf32>, vector<16x16xf32> -> vector<16x16xf32>
    %210 = arith.mulf %201, %201 : vector<16x16xf32>
    %211 = arith.mulf %203, %203 : vector<16x16xf32>
    %212 = arith.mulf %201, %203 : vector<16x16xf32>
    %213 = arith.subf %205, %210 : vector<16x16xf32>
    %214 = arith.subf %207, %211 : vector<16x16xf32>
    %215 = arith.subf %209, %212 : vector<16x16xf32>
    %cst_108 = arith.constant 2.000000e+00 : f32
    %216 = vector.broadcast %cst_108 : f32 to vector<16x16xf32>
    %217 = arith.mulf %216, %215 : vector<16x16xf32>
    %cst_109 = arith.constant 5.852250e+01 : f32
    %218 = vector.broadcast %cst_109 : f32 to vector<16x16xf32>
    %219 = arith.addf %217, %218 : vector<16x16xf32>
    %220 = arith.addf %213, %214 : vector<16x16xf32>
    %cst_110 = arith.constant 5.852250e+01 : f32
    %221 = vector.broadcast %cst_110 : f32 to vector<16x16xf32>
    %222 = arith.addf %220, %221 : vector<16x16xf32>
    %223 = tpu.reciprocal %222 {approx = true} : vector<16x16xf32> -> vector<16x16xf32>
    %224 = arith.mulf %219, %223 : vector<16x16xf32>
    %225 = arith.mulf %224, %224 : vector<16x16xf32>
    %226 = arith.mulf %183, %225 : vector<16x16xf32>
    %c4 = arith.constant 4 : index
    %c0_111 = arith.constant 0 : index
    %c0_112 = arith.constant 0 : index
    %227 = vector.load %arg3[%c4, %c0_111, %c0_112] : memref<5x16x16xf32, #tpu.memory_space<vmem>>, vector<1x16x16xf32>
    %228 = vector.shape_cast %227 : vector<1x16x16xf32> to vector<16x16xf32>
    %c4_113 = arith.constant 4 : index
    %c0_114 = arith.constant 0 : index
    %c0_115 = arith.constant 0 : index
    %229 = vector.load %arg4[%c4_113, %c0_114, %c0_115] : memref<5x16x16xf32, #tpu.memory_space<vmem>>, vector<1x16x16xf32>
    %230 = vector.shape_cast %229 : vector<1x16x16xf32> to vector<16x16xf32>
    %cst_116 = arith.constant dense<0.000000e+00> : vector<80x16xf32>
    %231 = tpu.matmul %194, %230, %cst_116 {dimension_numbers = #tpu.dot_dimension_numbers<[1], [0], [0], [1], [0, 0, 1, 1], [], []>} : vector<80x16xf32>, vector<16x16xf32>, vector<80x16xf32> -> vector<80x16xf32>
    %232 = vector.extract_strided_slice %231 {offsets = [0, 0], sizes = [16, 16], strides = [1, 1]} : vector<80x16xf32> to vector<16x16xf32>
    %cst_117 = arith.constant dense<0.000000e+00> : vector<16x16xf32>
    %233 = tpu.matmul %228, %232, %cst_117 {dimension_numbers = #tpu.dot_dimension_numbers<[1], [0], [0], [1], [0, 0, 1, 1], [], []>} : vector<16x16xf32>, vector<16x16xf32>, vector<16x16xf32> -> vector<16x16xf32>
    %234 = vector.extract_strided_slice %231 {offsets = [16, 0], sizes = [16, 16], strides = [1, 1]} : vector<80x16xf32> to vector<16x16xf32>
    %cst_118 = arith.constant dense<0.000000e+00> : vector<16x16xf32>
    %235 = tpu.matmul %228, %234, %cst_118 {dimension_numbers = #tpu.dot_dimension_numbers<[1], [0], [0], [1], [0, 0, 1, 1], [], []>} : vector<16x16xf32>, vector<16x16xf32>, vector<16x16xf32> -> vector<16x16xf32>
    %236 = vector.extract_strided_slice %231 {offsets = [32, 0], sizes = [16, 16], strides = [1, 1]} : vector<80x16xf32> to vector<16x16xf32>
    %cst_119 = arith.constant dense<0.000000e+00> : vector<16x16xf32>
    %237 = tpu.matmul %228, %236, %cst_119 {dimension_numbers = #tpu.dot_dimension_numbers<[1], [0], [0], [1], [0, 0, 1, 1], [], []>} : vector<16x16xf32>, vector<16x16xf32>, vector<16x16xf32> -> vector<16x16xf32>
    %238 = vector.extract_strided_slice %231 {offsets = [48, 0], sizes = [16, 16], strides = [1, 1]} : vector<80x16xf32> to vector<16x16xf32>
    %cst_120 = arith.constant dense<0.000000e+00> : vector<16x16xf32>
    %239 = tpu.matmul %228, %238, %cst_120 {dimension_numbers = #tpu.dot_dimension_numbers<[1], [0], [0], [1], [0, 0, 1, 1], [], []>} : vector<16x16xf32>, vector<16x16xf32>, vector<16x16xf32> -> vector<16x16xf32>
    %240 = vector.extract_strided_slice %231 {offsets = [64, 0], sizes = [16, 16], strides = [1, 1]} : vector<80x16xf32> to vector<16x16xf32>
    %cst_121 = arith.constant dense<0.000000e+00> : vector<16x16xf32>
    %241 = tpu.matmul %228, %240, %cst_121 {dimension_numbers = #tpu.dot_dimension_numbers<[1], [0], [0], [1], [0, 0, 1, 1], [], []>} : vector<16x16xf32>, vector<16x16xf32>, vector<16x16xf32> -> vector<16x16xf32>
    %242 = arith.mulf %233, %233 : vector<16x16xf32>
    %243 = arith.mulf %235, %235 : vector<16x16xf32>
    %244 = arith.mulf %233, %235 : vector<16x16xf32>
    %245 = arith.subf %237, %242 : vector<16x16xf32>
    %246 = arith.subf %239, %243 : vector<16x16xf32>
    %247 = arith.subf %241, %244 : vector<16x16xf32>
    %cst_122 = arith.constant 2.000000e+00 : f32
    %248 = vector.broadcast %cst_122 : f32 to vector<16x16xf32>
    %249 = arith.mulf %248, %247 : vector<16x16xf32>
    %cst_123 = arith.constant 5.852250e+01 : f32
    %250 = vector.broadcast %cst_123 : f32 to vector<16x16xf32>
    %251 = arith.addf %249, %250 : vector<16x16xf32>
    %252 = arith.addf %245, %246 : vector<16x16xf32>
    %cst_124 = arith.constant 5.852250e+01 : f32
    %253 = vector.broadcast %cst_124 : f32 to vector<16x16xf32>
    %254 = arith.addf %252, %253 : vector<16x16xf32>
    %255 = tpu.reciprocal %254 {approx = true} : vector<16x16xf32> -> vector<16x16xf32>
    %256 = arith.mulf %251, %255 : vector<16x16xf32>
    %257 = arith.mulf %256, %256 : vector<16x16xf32>
    %258 = arith.mulf %257, %256 : vector<16x16xf32>
    %259 = arith.mulf %226, %258 : vector<16x16xf32>
    %cst_125 = arith.constant 2.000000e+00 : f32
    %260 = vector.broadcast %cst_125 : f32 to vector<16x16xf32>
    %261 = arith.mulf %260, %244 : vector<16x16xf32>
    %cst_126 = arith.constant 6.502500e+00 : f32
    %262 = vector.broadcast %cst_126 : f32 to vector<16x16xf32>
    %263 = arith.addf %261, %262 : vector<16x16xf32>
    %264 = arith.addf %242, %243 : vector<16x16xf32>
    %cst_127 = arith.constant 6.502500e+00 : f32
    %265 = vector.broadcast %cst_127 : f32 to vector<16x16xf32>
    %266 = arith.addf %264, %265 : vector<16x16xf32>
    %267 = tpu.reciprocal %266 {approx = true} : vector<16x16xf32> -> vector<16x16xf32>
    %268 = arith.mulf %263, %267 : vector<16x16xf32>
    %269 = arith.mulf %268, %268 : vector<16x16xf32>
    %270 = arith.mulf %269, %268 : vector<16x16xf32>
    %c4_128 = arith.constant 4 : index
    %c0_129 = arith.constant 0 : index
    %c0_130 = arith.constant 0 : index
    %271 = vector.load %arg3[%c4_128, %c0_129, %c0_130] : memref<5x16x16xf32, #tpu.memory_space<vmem>>, vector<1x16x16xf32>
    %272 = vector.shape_cast %271 : vector<1x16x16xf32> to vector<16x16xf32>
    %cst_131 = arith.constant dense<0.000000e+00> : vector<16x16xf32>
    %273 = tpu.matmul %272, %190, %cst_131 {dimension_numbers = #tpu.dot_dimension_numbers<[1], [0], [0], [1], [0, 0, 1, 1], [], []>} : vector<16x16xf32>, vector<16x16xf32>, vector<16x16xf32> -> vector<16x16xf32>
    %c4_132 = arith.constant 4 : index
    %c0_133 = arith.constant 0 : index
    %c0_134 = arith.constant 0 : index
    %274 = vector.load %arg4[%c4_132, %c0_133, %c0_134] : memref<5x16x16xf32, #tpu.memory_space<vmem>>, vector<1x16x16xf32>
    %275 = vector.shape_cast %274 : vector<1x16x16xf32> to vector<16x16xf32>
    %cst_135 = arith.constant dense<0.000000e+00> : vector<16x16xf32>
    %276 = tpu.matmul %273, %275, %cst_135 {dimension_numbers = #tpu.dot_dimension_numbers<[1], [0], [0], [1], [0, 0, 1, 1], [], []>} : vector<16x16xf32>, vector<16x16xf32>, vector<16x16xf32> -> vector<16x16xf32>
    %277 = arith.mulf %270, %259 : vector<16x16xf32>
    %cst_136 = arith.constant 1.000000e+00 : f32
    %278 = vector.broadcast %cst_136 : f32 to vector<16x16xf32>
    %279 = arith.subf %278, %277 : vector<16x16xf32>
    %cst_137 = arith.constant 1.680000e+02 : f32
    %280 = vector.broadcast %cst_137 : f32 to vector<16x16xf32>
    %281 = arith.mulf %280, %279 : vector<16x16xf32>
    %cst_138 = arith.constant 0.0418300666 : f32
    %282 = vector.broadcast %cst_138 : f32 to vector<16x16xf32>
    %283 = arith.mulf %282, %276 : vector<16x16xf32>
    %284 = arith.addf %281, %283 : vector<16x16xf32>
    %285 = vector.shape_cast %284 : vector<16x16xf32> to vector<1x16x16xf32>
    %cst_139 = arith.constant dense<0.000000e+00> : vector<1xf32>
    %286 = vector.multi_reduction <add>, %285, %cst_139 [1, 2] : vector<1x16x16xf32> to vector<1xf32>
    %287 = vector.shape_cast %286 : vector<1xf32> to vector<1x1x1xf32>
    %288 = vector.extract %287[0, 0, 0] : f32 from vector<1x1x1xf32>
    %289 = vector.broadcast %288 : f32 to vector<1x1xf32>
    %cst_140 = arith.constant 2.560000e+02 : f32
    %290 = vector.broadcast %cst_140 : f32 to vector<1x1xf32>
    %291 = arith.divf %289, %290 : vector<1x1xf32>
    %292 = vector.shape_cast %291 : vector<1x1xf32> to vector<1x1x1xf32>
    %c0_141 = arith.constant 0 : index
    %c0_142 = arith.constant 0 : index
    %c0_143 = arith.constant 0 : index
    %293 = vector.load %arg5[%c0_141, %c0_142, %c0_143] : memref<1x1x1xf32, #tpu.memory_space<vmem>>, vector<1x1x1xf32>
    tpu.vector_store %arg5[%c0_141, %c0_142, %c0_143], %292 {strides = array<i32>} : memref<1x1x1xf32, #tpu.memory_space<vmem>>, vector<1x1x1xf32>,
    return
  }
  func.func @transform_0(%arg0: i32) -> (i32, i32, i32, i32) {
    %c0_i32 = arith.constant 0 : i32
    %c0_i32_0 = arith.constant 0 : i32
    %c0_i32_1 = arith.constant 0 : i32
    %c0_i32_2 = arith.constant 0 : i32
    return %arg0, %c0_i32, %c0_i32_0, %c0_i32_1 : i32, i32, i32, i32
  }
  func.func @transform_1(%arg0: i32) -> (i32, i32, i32, i32) {
    %c0_i32 = arith.constant 0 : i32
    %c0_i32_0 = arith.constant 0 : i32
    %c0_i32_1 = arith.constant 0 : i32
    %c0_i32_2 = arith.constant 0 : i32
    return %arg0, %c0_i32, %c0_i32_0, %c0_i32_1 : i32, i32, i32, i32
  }
  func.func @transform_2(%arg0: i32) -> (i32, i32, i32) {
    %c0_i32 = arith.constant 0 : i32
    %c0_i32_0 = arith.constant 0 : i32
    %c0_i32_1 = arith.constant 0 : i32
    %c0_i32_2 = arith.constant 0 : i32
    return %c0_i32, %c0_i32_0, %c0_i32_1 : i32, i32, i32
  }
  func.func @transform_3(%arg0: i32) -> (i32, i32, i32) {
    %c0_i32 = arith.constant 0 : i32
    %c0_i32_0 = arith.constant 0 : i32
    %c0_i32_1 = arith.constant 0 : i32
    %c0_i32_2 = arith.constant 0 : i32
    return %c0_i32, %c0_i32_0, %c0_i32_1 : i32, i32, i32
  }
  func.func @transform_4(%arg0: i32) -> (i32, i32, i32) {
    %c0_i32 = arith.constant 0 : i32
    %c0_i32_0 = arith.constant 0 : i32
    %c0_i32_1 = arith.constant 0 : i32
    return %arg0, %c0_i32, %c0_i32_0 : i32, i32, i32
  }
}

</mosaic_0001>

<bundles_post_ra>
// kernel: tpu_custom_call.1
= control target key start
LH: loop header
LB: loop body
LE: loop exit
PB: predicated region body
PF: predicated region fallthrough
CT: control target
= control target key end

     0   :  { %9 = vsyncpa [#allocation3], 0  ;;  %s6226_s0 = inlined_call_operand.hbm [shape: f32[2,3,16,16], index: 0, kind: input, shape index: {}]   ;;  %s6227_s1 = inlined_call_operand.hbm [shape: f32[2,3,16,16], index: 1, kind: input, shape index: {}]   ;;  %s6228_s2 = inlined_call_operand.hbm [shape: f32[5,16,16], index: 2, kind: input, shape index: {}]   ;;  %s6229_s3 = inlined_call_operand.hbm [shape: f32[5,16,16], index: 3, kind: input, shape index: {}]   ;;  %s6230_s4 = inlined_call_operand.vmem [shape: f32[2,1,1], index: 4, kind: output, shape index: {}]  }
   0x1   :  { %11 = vsyncpa [#allocation3 + $0x1], 0 }
   0x2   :  { %12 = vsyncpa [#allocation5], 0 }
   0x3   :  { %14 = vsyncpa [#allocation5 + $0x1], 0 }
   0x4   :  { %15 = vsyncpa [#allocation8], 0  ;;  %s5675_s15 = smov 0   ;;  %s5677_s16 = smov 0  }
   0x5   :  { %s5679_s17 = smov 0   ;;  %s5681_s18 = smov 0  }
   0x6 LB: > { %s5694_s19 = sadd.s32 4294967295, %s5642_s18   ;;  %p41_p0 = scmp.ne.s32.totalorder %s5634_s16, %s5630_s15  ;;  %s5642_s18 = sphi %s5681_s18, %s6247_s18   ;;  %s5638_s17 = sphi %s5679_s17, %s6246_s17   ;;  %s5634_s16 = sphi %s5677_s16, %s6245_s16   ;;  %s5630_s15 = sphi %s5675_s15, %s6244_s15  }
   0x7   : > { %p6231_p1 = scmp.eq.s32.totalorder %s5694_s19, 0  ;;  %p4411_p2 = scmp.ge.s32.totalorder %s5642_s18, 1 }
   0x8   : > { %p146_p3 = scmp.lt.s32.totalorder %s5642_s18, 3  ;;  %s5644_s22 = smov [#allocation6]  }
   0x9   : > { %p5702_p4 = por %p6231_p1, %p41_p0  ;;  %s158_s23 = sshll.u32 %s5644_s22, 4  ;;  %s159_s23 = int_to_ptr.vmem [resolvable:$true] %s158_s23 }
   0xa   : > { %p5706_p5 = pnand %p4411_p2, %p146_p3  ;;  %s5645_s25 = smov [#allocation7]  }
   0xb   : > { %s6234_s20 = scalar_select %p5702_p4, 1, 0 }
   0xc   : > { %s6235_s21 = scalar_select %p5706_p5, 1, 0 }
   0xd   : > { %p5393_p6 = pneg %p5706_p5  ;;  %s171_s26 = sshll.u32 %s5645_s25, 4  ;;  %s5718_s26 = int_to_ptr.vmem [resolvable:$true] %s171_s26 }
   0xe   : > { %s5480_s29 = scalar_lea.hbm %s6228_s2, 1280 }
   0xf   : > { %p5714_p7 = pnand %p5393_p6, %p6231_p1  ;;  %p5481_p8 = scmp.ne.s32.totalorder %s6228_s2, %s5480_s29 }
  0x10   : > { %p5487_p12 = scmp.lt.u32.totalorder %s5480_s29, %s6228_s2 }
  0x11   : > { %p5482_p9 = pneg %p5714_p7 }
  0x13   : > { %p5483_p10 = pnand %p5482_p9, %p5481_p8 }
  0x15   : > { %p5484_p11 = pneg %p5483_p10 }
  0x17   : > { %p5489_p13 = pnand %p5487_p12, %p5484_p11 }
  0x19   : > { %5492 = shalt.err (!%p5489_p13)
}
  0x1a   : > { %s5493_s8 = scalar_lea.vmem %s159_s23, 1280  ;;  %p5501_p6 = scmp.lt.s32.totalorder %s159_s23, %s159_s23 }
  0x1b   : > { %p5494_p0 = scmp.ne.s32.totalorder %s159_s23, %s5493_s8  ;;  %p5502_p1 = scmp.lt.s32.totalorder %s5493_s8, %s5493_s8 }
  0x1d   : > { %p5496_p2 = pnand %p5494_p0, %p5482_p9  ;;  %p5503_p4 = por %p5502_p1, %p5501_p6 }
  0x1f   : > { %p5497_p3 = pneg %p5496_p2 }
  0x21   : > { %p5504_p5 = pnand %p5503_p4, %p5497_p3 }
  0x23   : > { %5507 = shalt.err (!%p5504_p5)
}
  0x24   : > { %s5646_s9 = smov 128   ;;  %s5647_s10 = smov 8  }
  0x25   : > { %5396 = dma.hbm_to_vmem [thread:$0]  (!%p5714_p7), %s6228_s2, 1280, %s159_s23, [#allocation5], %s5646_s9, %s5646_s9, %s5647_s10  }
  0x26   : > { %s5508_s15 = scalar_lea.hbm %s6229_s3, 1280 }
  0x27   : > { %p5509_p1 = scmp.ne.s32.totalorder %s6229_s3, %s5508_s15  ;;  %p5515_p8 = scmp.lt.u32.totalorder %s5508_s15, %s6229_s3 }
  0x29   : > { %p5511_p4 = pnand %p5509_p1, %p5482_p9 }
  0x2b   : > { %p5512_p5 = pneg %p5511_p4 }
  0x2d   : > { %p5517_p10 = pnand %p5515_p8, %p5512_p5 }
  0x2f   : > { %5520 = shalt.err (!%p5517_p10)
}
  0x30   : > { %s5521_s23 = scalar_lea.vmem %s5718_s26, 1280  ;;  %p5529_p0 = scmp.lt.s32.totalorder %s5718_s26, %s5718_s26 }
  0x31   : > { %p5522_p11 = scmp.ne.s32.totalorder %s5718_s26, %s5521_s23  ;;  %p5530_p2 = scmp.lt.s32.totalorder %s5521_s23, %s5521_s23 }
  0x33   : > { %p5524_p12 = pnand %p5522_p11, %p5482_p9  ;;  %p5531_p3 = por %p5530_p2, %p5529_p0 }
  0x35   : > { %p5525_p13 = pneg %p5524_p12 }
  0x37   : > { %p5532_p6 = pnand %p5531_p3, %p5525_p13 }
  0x39   : > { %5535 = shalt.err (!%p5532_p6)
}
  0x3a   : > { %5399 = dma.hbm_to_vmem [thread:$0]  (!%p5714_p7), %s6229_s3, 1280, %s5718_s26, [#allocation8], %s5646_s9, %s5646_s9, %s5647_s10  }
  0x3b   : > { %s5774_s24 = sadd.s32 1, %s5642_s18   ;;  %s28_s5 = sadd.s32 1, %s5638_s17 }
  0x3c   : > { %s25_s6 = ssub.s32 %s5642_s18, %s5774_s24  ;;  %p35_p9 = scmp.ne.s32.totalorder %s5638_s17, %s5634_s16 }
  0x3d   : > { %p26_p1 = scmp.eq.s32.totalorder %s25_s6, 0  ;;  %p36_p4 = scmp.eq.s32.totalorder %s5642_s18, 0 }
  0x3e   : > { %p5409_p5 = scmp.lt.s32.totalorder %s5642_s18, 2  ;;  %s185_s7 = sand.u32 1, %s5638_s17  }
  0x3f   : > { %s5785_s8 = scalar_select %p26_p1, %s5638_s17, %s28_s5  }
  0x40   : > { %p37_p8 = por %p36_p4, %p35_p9  ;;  %s5787_s11 = smul.u32 48, %s185_s7 }
  0x41   : > { %s206_s12 = sand.u32 1, %s5642_s18   ;;  %s5375_s13 = smul.u32 768, %s5642_s18 }
  0x42   : > { %p5791_p10 = pnand %p5409_p5, %p37_p8  ;;  %s189_s25 = scalar_lea.vmem [#allocation2], %s5787_s11 }
  0x43   : > { %s5800_s22 = scalar_lea.hbm %s6226_s0, %s5375_s13  ;;  %s196_s27 = sshll.u32 %s189_s25, 4  ;;  %s5803_s27 = int_to_ptr.vmem [resolvable:$true] %s196_s27 }
  0x44   : > { %s5805_s28 = scalar_lea.sflag [#allocation3], %s185_s7  ;;  %s5536_s23 = scalar_lea.hbm %s5800_s22, 768 }
  0x45   : > { %p5537_p7 = scmp.ne.s32.totalorder %s5800_s22, %s5536_s23  ;;  %p5538_p11 = pneg %p5791_p10 }
  0x46   : > { %s5541_s5 = scalar_lea.hbm %s6226_s0, 1536  ;;  %p5542_p0 = scmp.lt.u32.totalorder %s5800_s22, %s6226_s0 }
  0x47   : > { %p5539_p12 = pnand %p5538_p11, %p5537_p7  ;;  %p5543_p2 = scmp.lt.u32.totalorder %s5541_s5, %s5536_s23 }
  0x48   : > { %p5545_p6 = scmp.lt.u32.totalorder %s5536_s23, %s5800_s22 }
  0x49   : > { %p5540_p13 = pneg %p5539_p12  ;;  %p5544_p3 = por %p5543_p2, %p5542_p0 }
  0x4b   : > { %p5546_p9 = por %p5545_p6, %p5544_p3 }
  0x4d   : > { %p5547_p1 = pnand %p5546_p9, %p5540_p13 }
  0x4f   : > { %5550 = shalt.err (!%p5547_p1)
}
  0x50   : > { %s5551_s7 = scalar_lea.vmem %s5803_s27, 768  ;;  %s5648_s15 = smov [#allocation2]  }
  0x51   : > { %p5552_p4 = scmp.ne.s32.totalorder %s5803_s27, %s5551_s7  ;;  %s5556_s25 = sshll.u32 %s5648_s15, 4  ;;  %s5557_s25 = int_to_ptr.vmem [resolvable:$false] %s5556_s25 }
  0x52   : > { %s5558_s29 = scalar_lea.vmem %s5557_s25, 1536  ;;  %p5559_p7 = scmp.lt.s32.totalorder %s5803_s27, %s5557_s25 }
  0x53   : > { %p5554_p5 = pnand %p5552_p4, %p5538_p11  ;;  %p5560_p12 = scmp.lt.s32.totalorder %s5558_s29, %s5551_s7 }
  0x55   : > { %p5555_p8 = pneg %p5554_p5  ;;  %p5561_p0 = por %p5560_p12, %p5559_p7 }
  0x57   : > { %p5562_p2 = pnand %p5561_p0, %p5555_p8 }
  0x59   : > { %5565 = shalt.err (!%p5562_p2)
}
  0x5a   : > { %5403 = dma.hbm_to_vmem [thread:$0]  (!%p5791_p10), %s5800_s22, 768, %s5803_s27, %s5805_s28, %s5646_s9, %s5646_s9, %s5647_s10  }
  0x5b   : > { %s5841_s5 = scalar_lea.hbm %s6227_s1, %s5375_s13  ;;  %s210_s6 = scalar_lea.vmem [#allocation4], %s5787_s11 }
  0x5c   : > { %s217_s14 = sshll.u32 %s210_s6, 4  ;;  %s5848_s7 = scalar_lea.sflag [#allocation5], %s206_s12  ;;  %s5844_s14 = int_to_ptr.vmem [resolvable:$true] %s217_s14 }
  0x5d   : > { %s5566_s15 = scalar_lea.hbm %s5841_s5, 768  ;;  %s5571_s27 = scalar_lea.hbm %s6227_s1, 1536 }
  0x5e   : > { %p5567_p13 = scmp.ne.s32.totalorder %s5841_s5, %s5566_s15  ;;  %p5572_p9 = scmp.lt.u32.totalorder %s5841_s5, %s6227_s1 }
  0x5f   : > { %p5573_p1 = scmp.lt.u32.totalorder %s5571_s27, %s5566_s15  ;;  %p5575_p5 = scmp.lt.u32.totalorder %s5566_s15, %s5841_s5 }
  0x60   : > { %p5569_p3 = pnand %p5567_p13, %p5538_p11 }
  0x61   : > { %p5574_p4 = por %p5573_p1, %p5572_p9 }
  0x62   : > { %p5570_p6 = pneg %p5569_p3 }
  0x63   : > { %p5576_p8 = por %p5575_p5, %p5574_p4 }
  0x65   : > { %p5577_p7 = pnand %p5576_p8, %p5570_p6 }
  0x67   : > { %5580 = shalt.err (!%p5577_p7)
}
  0x68   : > { %s5581_s18 = scalar_lea.vmem %s5844_s14, 768  ;;  %s5649_s11 = smov [#allocation4]  }
  0x69   : > { %p5582_p12 = scmp.ne.s32.totalorder %s5844_s14, %s5581_s18  ;;  %s5586_s12 = sshll.u32 %s5649_s11, 4  ;;  %s5587_s12 = int_to_ptr.vmem [resolvable:$false] %s5586_s12 }
  0x6a   : > { %s5588_s29 = scalar_lea.vmem %s5587_s12, 1536  ;;  %p5589_p13 = scmp.lt.s32.totalorder %s5844_s14, %s5587_s12 }
  0x6b   : > { %p5584_p0 = pnand %p5582_p12, %p5538_p11  ;;  %p5590_p3 = scmp.lt.s32.totalorder %s5588_s29, %s5581_s18 }
  0x6d   : > { %p5585_p2 = pneg %p5584_p0  ;;  %p5591_p9 = por %p5590_p3, %p5589_p13 }
  0x6f   : > { %p5592_p1 = pnand %p5591_p9, %p5585_p2 }
  0x71   : > { %5595 = shalt.err (!%p5592_p1)
}
  0x72   : > { %5406 = dma.hbm_to_vmem [thread:$0]  (!%p5791_p10), %s5841_s5, 768, %s5844_s14, %s5848_s7, %s5646_s9, %s5646_s9, %s5647_s10  }
  0x73   : > { %p6238_p11 = scmp.ne.s32.totalorder %s6235_s21, 0 }
  0x74   : > { %s231_s23 = sand.u32 (!%p6238_p11), 1, %s5634_s16   ;;  %p6239_p6 = scmp.ne.s32.totalorder (!%p6238_p11), %s6234_s20, 0 }
  0x75   : > { %229 = sbr.rel (%p6238_p11) target bundleno = 950 (0x3b6), region = 36  ;;  %s232_s6 = scalar_lea.sflag (!%p6238_p11), [#allocation3], %s231_s23 }
  0x76   : > { %s5378_s30 = smul.u32 (!%p6238_p11), 48, %s231_s23 }
  0x78   : > { %s5880_s15 = scalar_lea.vmem (!%p6238_p11), [#allocation2], %s5378_s30 }
  0x7c   : > { %5613 = dma.done.wait (%p6239_p6), %s232_s6, 768  }
  0x7d   : > { %5615 = vsyncadd (%p6239_p6), %s232_s6, 4294966528  ;;  %s240_s26 = sand.u32 1, %s5694_s19   ;;  %s5887_s9 = scalar_lea.vmem [#allocation4], %s5378_s30 }
  0x7e   : > { %s241_s22 = scalar_lea.sflag [#allocation5], %s240_s26 }
  0x7f   : > { %5617 = dma.done.wait (%p6239_p6), %s241_s22, 768  }
  0x80   : > { %5619 = vsyncadd (%p6239_p6), %s241_s22, 4294966528  ;;  %p6240_p10 = scmp.eq.s32.totalorder %s5694_s19, 0 }
  0x82   : > { %5621 = dma.done.wait (%p6240_p10), [#allocation5], 1280   ;;  %p6241_p4 = pmov %p6240_p10 }
  0x84   : > { %5623 = vsyncadd (%p6241_p4), [#allocation5], 4294966016  ;;  %p6242_p5 = pmov %p6241_p4 }
  0x85   : > { %p6243_p8 = pmov %p6241_p4 }
  0x86   : > { %5625 = dma.done.wait (%p6242_p5), [#allocation8], 1280  }
  0x87   : > { %5627 = vsyncadd (%p6243_p8), [#allocation8], 4294966016  ;;  %vm303_vm0 = vcmask 130048   ;;  %v301_v0 = vld [vmem:[#allocation7] sm:$0xff]  ;;  %v302_v1 = vld [vmem:[#allocation7 + $0x8] sm:$0xff]  ;;  %p280_p7 = scmp.lt.s32.totalorder %s5694_s19, 1 }
  0x88   : > { %v283_v2 = vld [vmem:[%s5880_s15] sm:$0xff]  ;;  %v5198_v3 = vpack.c.bf16 %v302_v1, %v301_v0  ;;  %v863_v5 = vld [vmem:[#allocation7 + $0x18] sm:$0xff]  ;;  %v5911_v13 = vld [vmem:[%s5880_s15 + $0x10] sm:$0xff]  ;;  %vm4307_vm1 = vcmask 0  }
  0x89   : > { %4810 = vmatprep.mubr.msk.f32.mxu0 %vm303_vm0, %v283_v2  ;;  %v862_v4 = vld [vmem:[#allocation7 + $0x10] sm:$0xff]  ;;  %v284_v7 = vld [vmem:[%s5880_s15 + $0x8] sm:$0xff]  ;;  %v293_v10 = vmul.f32 %v283_v2, %v283_v2  ;;  %v5914_v14 = vld [vmem:[%s5880_s15 + $0x18] sm:$0xff]  ;;  %v1400_v47 = vmul.f32 %v5911_v13, %v5911_v13  ;;  %s6249_s19 = smov (!%p280_p7, %s5694_s19), 1 }
  0x8a   : > { %v5222_v6 = vpack.c.bf16 %v863_v5, %v862_v4  ;;  %5199 = vmatprep.subr.bf16.mxu0 %v5198_v3  ;;  %v285_v8 = vld [vmem:[%s5887_s9] sm:$0xff]  ;;  %v286_v9 = vld [vmem:[%s5887_s9 + $0x8] sm:$0xff]  ;;  %v294_v11 = vmul.f32 %v284_v7, %v284_v7  ;;  %v5917_v16 = vld [vmem:[%s5887_s9 + $0x10] sm:$0xff]  ;;  %v1401_v48 = vmul.f32 %v5914_v14, %v5914_v14  ;;  %s282_s5 = scalar_lea.vmem %s6230_s4, %s6249_s19 }
  0x8b   : > { %5201 = vmatpush3.bf16.msra.mxu0 %v5198_v3  ;;  %v295_v12 = vmul.f32 %v285_v8, %v285_v8  ;;  %v296_v15 = vmul.f32 %v286_v9, %v286_v9  ;;  %v5920_v17 = vld [vmem:[%s5887_s9 + $0x18] sm:$0xff]  ;;  %v5923_v18 = vld [vmem:[%s5880_s15 + $0x20] sm:$0xff]  ;;  %v5927_v19 = vld [vmem:[%s5880_s15 + $0x28] sm:$0xff]  ;;  %v287_v22 = vsub.f32 %v283_v2, %v285_v8  ;;  %v288_v23 = vsub.f32 %v284_v7, %v286_v9 }
  0x8c   : > { %5223 = vmatprep.subr.bf16.mxu0 %v5222_v6  ;;  %v5930_v20 = vld [vmem:[%s5887_s9 + $0x20] sm:$0xff]  ;;  %v5933_v21 = vld [vmem:[%s5887_s9 + $0x28] sm:$0xff]  ;;  %v1394_v24 = vsub.f32 %v5911_v13, %v5917_v16  ;;  %v1395_v25 = vsub.f32 %v5914_v14, %v5920_v17  ;;  %v297_v26 = vmul.f32 %v285_v8, %v283_v2  ;;  %v298_v35 = vmul.f32 %v286_v9, %v284_v7 }
  0x8d   : > { %v3018_v27 = vsub.f32 %v5923_v18, %v5930_v20  ;;  %v3019_v28 = vsub.f32 %v5927_v19, %v5933_v21  ;;  %v289_v29 = vand.u32 2147483647, %v287_v22  ;;  %v290_v30 = vand.u32 2147483647, %v288_v23  ;;  %v1956_v39 = vld [vmem:[#allocation7 + $0x20] sm:$0xff]  ;;  %v1957_v40 = vld [vmem:[#allocation7 + $0x28] sm:$0xff] }
  0x8e   : > { %4811 = vmatmul.mubr.msk.f32.vlgmr.msra.gmra.mrb[0].mxu0 %vm303_vm0, %v284_v7  ;;  %v1396_v31 = vand.u32 2147483647, %v1394_v24  ;;  %v1397_v32 = vand.u32 2147483647, %v1395_v25  ;;  %v5270_v43 = vpack.c.bf16 %v1957_v40, %v1956_v39  ;;  %v2488_v44 = vld [vmem:[#allocation7 + $0x30] sm:$0xff]  ;;  %v2489_v45 = vld [vmem:[#allocation7 + $0x38] sm:$0xff]  ;;  %v1402_v49 = vmul.f32 %v5917_v16, %v5917_v16 }
  0x8f   : > { %5225 = vmatpush3.bf16.msra.mxu0 %v5222_v6  ;;  %4813 = vmatprep.mubr.msk.f32.mxu0 %vm303_vm0, %v285_v8  ;;  %v3020_v33 = vand.u32 2147483647, %v3018_v27  ;;  %v3021_v34 = vand.u32 2147483647, %v3019_v28  ;;  %v5294_v46 = vpack.c.bf16 %v2489_v45, %v2488_v44  ;;  %v1403_v50 = vmul.f32 %v5920_v17, %v5920_v17  ;;  %v3582_v53 = vld [vmem:[#allocation7 + $0x40] sm:$0xff]  ;;  %v3583_v54 = vld [vmem:[#allocation7 + $0x48] sm:$0xff] }
  0x90   : > { %5247 = vmatprep.subr.bf16.mxu0 %v5222_v6  ;;  %v1398_v36 = vadd.f32 %v1396_v31, %v289_v29  ;;  %v1399_v37 = vadd.f32 %v1397_v32, %v290_v30  ;;  %v1404_v51 = vmul.f32 %v5917_v16, %v5911_v13  ;;  %v1405_v52 = vmul.f32 %v5920_v17, %v5914_v14  ;;  %v6013_v56 = vld [vmem:[#allocation6] sm:$0xff]  ;;  %v6067_v0 = vld [vmem:[#allocation6 + $0x48] sm:$0xff]  ;;  %v6088_v23 = vld [vmem:[#allocation6 + $0x18] sm:$0xff] }
  0x91   : > { %v6001_v55 = vpack.c.bf16 %v3583_v54, %v3582_v53  ;;  %4829 = vmatprep.mubr.msk.f32.mxu1 %vm303_vm0, %v6013_v56  ;;  %v3024_v57 = vmul.f32 %v5923_v18, %v5923_v18  ;;  %v3025_v58 = vmul.f32 %v5927_v19, %v5927_v19  ;;  %v3026_v59 = vmul.f32 %v5930_v20, %v5930_v20  ;;  %v6062_v63 = vld [vmem:[#allocation6 + $0x40] sm:$0xff] }
  0x92   : > { %4814 = vmatmul.mubr.msk.f32.gmra.mrb[2].mxu0 %vm303_vm0, %v286_v9  ;;  %v3022_v38 = vadd.f32 %v3020_v33, %v1398_v36  ;;  %v3023_v41 = vadd.f32 %v3021_v34, %v1399_v37  ;;  %v3027_v60 = vmul.f32 %v5933_v21, %v5933_v21  ;;  %v3028_v61 = vmul.f32 %v5930_v20, %v5923_v18 }
  0x93   : > { %4816 = vmatprep.mubr.msk.f32.mxu0 %vm303_vm0, %v293_v10  ;;  %v3029_v62 = vmul.f32 %v5933_v21, %v5927_v19 }
  0x94   : > { %v5948_v42 = vpack.c.bf16 %v3023_v41, %v3022_v38 }
  0x96   : > { %4817 = vmatmul.mubr.msk.f32.gmra.mrb[4].mxu0 %vm303_vm0, %v294_v11 }
  0x97   : > { %4819 = vmatprep.mubr.msk.f32.mxu0 %vm303_vm0, %v295_v12 }
  0x9a   : > { %4820 = vmatmul.mubr.msk.f32.gmra.mrb[6].mxu0 %vm303_vm0, %v296_v15 }
  0x9b   : > { %4822 = vmatprep.mubr.msk.f32.mxu0 %vm303_vm0, %v297_v26 }
  0x9e   : > { %4823 = vmatmul.mubr.msk.f32.gmra.mrb[8].mxu0 %vm303_vm0, %v298_v35 }
  0x9f   : > { %4864 = vmatprep.mubr.msk.f32.mxu0 %vm303_vm0, %v283_v2 }
  0xa2   : > { %4865 = vmatmul.mubr.msk.f32.vlgmr.msra.gmra.mrb[10].mxu0 %vm303_vm0, %v284_v7 }
  0xa3   : > { %5249 = vmatpush3.bf16.msra.mxu0 %v5222_v6  ;;  %4867 = vmatprep.mubr.msk.f32.mxu0 %vm303_vm0, %v285_v8  ;;  %v300_v6 = vld [vmem:[#allocation6 + $0x8] sm:$0xff] }
  0xa4   : > { %5271 = vmatprep.subr.bf16.mxu0 %v5270_v43 }
  0xa6   : > { %4868 = vmatmul.mubr.msk.f32.gmra.mrb[12].mxu0 %vm303_vm0, %v286_v9 }
  0xa7   : > { %4870 = vmatprep.mubr.msk.f32.mxu0 %vm303_vm0, %v293_v10 }
  0xaa   : > { %4871 = vmatmul.mubr.msk.f32.gmra.mrb[14].mxu0 %vm303_vm0, %v294_v11 }
  0xab   : > { %4873 = vmatprep.mubr.msk.f32.mxu0 %vm303_vm0, %v295_v12 }
  0xae   : > { %4874 = vmatmul.mubr.msk.f32.gmra.mrb[16].mxu0 %vm303_vm0, %v296_v15 }
  0xaf   : > { %4876 = vmatprep.mubr.msk.f32.mxu0 %vm303_vm0, %v297_v26 }
  0xb2   : > { %4877 = vmatmul.mubr.msk.f32.gmra.mrb[18].mxu0 %vm303_vm0, %v298_v35 }
  0xb3   : > { %4918 = vmatprep.mubr.msk.f32.mxu0 %vm303_vm0, %v5911_v13 }
  0xb6   : > { %4919 = vmatmul.mubr.msk.f32.vlgmr.msra.gmra.mrb[20].mxu0 %vm303_vm0, %v5914_v14 }
  0xb7   : > { %5273 = vmatpush3.bf16.msra.mxu0 %v5270_v43  ;;  %4921 = vmatprep.mubr.msk.f32.mxu0 %vm303_vm0, %v5917_v16 }
  0xb8   : > { %5295 = vmatprep.subr.bf16.mxu0 %v5294_v46 }
  0xba   : > { %4922 = vmatmul.mubr.msk.f32.gmra.mrb[22].mxu0 %vm303_vm0, %v5920_v17 }
  0xbb   : > { %4924 = vmatprep.mubr.msk.f32.mxu0 %vm303_vm0, %v1400_v47 }
  0xbe   : > { %4925 = vmatmul.mubr.msk.f32.gmra.mrb[24].mxu0 %vm303_vm0, %v1401_v48 }
  0xbf   : > { %4927 = vmatprep.mubr.msk.f32.mxu0 %vm303_vm0, %v1402_v49 }
  0xc2   : > { %4928 = vmatmul.mubr.msk.f32.gmra.mrb[26].mxu0 %vm303_vm0, %v1403_v50 }
  0xc3   : > { %4930 = vmatprep.mubr.msk.f32.mxu0 %vm303_vm0, %v1404_v51 }
  0xc6   : > { %4931 = vmatmul.mubr.msk.f32.gmra.mrb[28].mxu0 %vm303_vm0, %v1405_v52 }
  0xc7   : > { %4972 = vmatprep.mubr.msk.f32.mxu0 %vm303_vm0, %v5911_v13 }
  0xca   : > { %4973 = vmatmul.mubr.msk.f32.vlgmr.msra.gmra.mrb[30].mxu0 %vm303_vm0, %v5914_v14 }
  0xcb   : > { %5297 = vmatpush3.bf16.msra.mxu0 %v5294_v46  ;;  %4975 = vmatprep.mubr.msk.f32.mxu0 %vm303_vm0, %v5917_v16 }
  0xcc   : > { %5319 = vmatprep.subr.bf16.mxu0 %v5294_v46 }
  0xce   : > { %4976 = vmatmul.mubr.msk.f32.gmra.mrb[32].mxu0 %vm303_vm0, %v5920_v17 }
  0xcf   : > { %4978 = vmatprep.mubr.msk.f32.mxu0 %vm303_vm0, %v1400_v47 }
  0xd2   : > { %4979 = vmatmul.mubr.msk.f32.gmra.mrb[34].mxu0 %vm303_vm0, %v1401_v48 }
  0xd3   : > { %4981 = vmatprep.mubr.msk.f32.mxu0 %vm303_vm0, %v1402_v49 }
  0xd6   : > { %4982 = vmatmul.mubr.msk.f32.gmra.mrb[36].mxu0 %vm303_vm0, %v1403_v50 }
  0xd7   : > { %4984 = vmatprep.mubr.msk.f32.mxu0 %vm303_vm0, %v1404_v51 }
  0xda   : > { %4985 = vmatmul.mubr.msk.f32.gmra.mrb[38].mxu0 %vm303_vm0, %v1405_v52 }
  0xdb   : > { %5026 = vmatprep.mubr.msk.f32.mxu0 %vm303_vm0, %v5911_v13 }
  0xde   : > { %5027 = vmatmul.mubr.msk.f32.vlgmr.msra.gmra.mrb[40].mxu0 %vm303_vm0, %v5914_v14 }
  0xdf   : > { %5321 = vmatpush3.bf16.msra.mxu0 %v5294_v46  ;;  %5029 = vmatprep.mubr.msk.f32.mxu0 %vm303_vm0, %v5917_v16 }
  0xe0   : > { %5343 = vmatprep.subr.bf16.mxu0 %v6001_v55 }
  0xe2   : > { %5030 = vmatmul.mubr.msk.f32.gmra.mrb[42].mxu0 %vm303_vm0, %v5920_v17 }
  0xe3   : > { %5032 = vmatprep.mubr.msk.f32.mxu0 %vm303_vm0, %v1400_v47 }
  0xe6   : > { %5033 = vmatmul.mubr.msk.f32.gmra.mrb[44].mxu0 %vm303_vm0, %v1401_v48 }
  0xe7   : > { %5035 = vmatprep.mubr.msk.f32.mxu0 %vm303_vm0, %v1402_v49 }
  0xea   : > { %5036 = vmatmul.mubr.msk.f32.gmra.mrb[46].mxu0 %vm303_vm0, %v1403_v50 }
  0xeb   : > { %5038 = vmatprep.mubr.msk.f32.mxu0 %vm303_vm0, %v1404_v51 }
  0xee   : > { %5039 = vmatmul.mubr.msk.f32.gmra.mrb[48].mxu0 %vm303_vm0, %v1405_v52  ;;  %v1953_v52 = vld [vmem:[#allocation6 + $0x20] sm:$0xff] }
  0xef   : > { %5080 = vmatprep.mubr.msk.f32.mxu0 %vm303_vm0, %v5923_v18 }
  0xf2   : > { %5081 = vmatmul.mubr.msk.f32.vlgmr.msra.gmra.mrb[50].mxu0 %vm303_vm0, %v5927_v19 }
  0xf3   : > { %5345 = vmatpush3.bf16.msra.mxu0 %v6001_v55  ;;  %5083 = vmatprep.mubr.msk.f32.mxu0 %vm303_vm0, %v5930_v20 }
  0xf4   : > { %5367 = vmatprep.subr.bf16.mxu0 %v5948_v42 }
  0xf6   : > { %5084 = vmatmul.mubr.msk.f32.gmra.mrb[52].mxu0 %vm303_vm0, %v5933_v21 }
  0xf7   : > { %5086 = vmatprep.mubr.msk.f32.mxu0 %vm303_vm0, %v3024_v57 }
  0xfa   : > { %5087 = vmatmul.mubr.msk.f32.gmra.mrb[54].mxu0 %vm303_vm0, %v3025_v58 }
  0xfb   : > { %5089 = vmatprep.mubr.msk.f32.mxu0 %vm303_vm0, %v3026_v59 }
  0xfe   : > { %5090 = vmatmul.mubr.msk.f32.gmra.mrb[56].mxu0 %vm303_vm0, %v3027_v60 }
  0xff   : > { %5092 = vmatprep.mubr.msk.f32.mxu0 %vm303_vm0, %v3028_v61 }
 0x102   : > { %5093 = vmatmul.mubr.msk.f32.gmra.mrb[58].mxu0 %vm303_vm0, %v3029_v62 }
 0x103   : > { %5134 = vmatprep.mubr.msk.f32.mxu0 %vm303_vm0, %v5923_v18 }
 0x106   : > { %5135 = vmatmul.mubr.msk.f32.vlgmr.msra.gmra.mrb[60].mxu0 %vm303_vm0, %v5927_v19 }
 0x107   : > { %5137 = vmatprep.mubr.msk.f32.mxu0 %vm303_vm0, %v5930_v20  ;;  %5369 = vmatpush3.bf16.msra.mxu0 %v5948_v42  ;;  %v6083_v20 = vld [vmem:[#allocation6 + $0x10] sm:$0xff] }
 0x10a   : > { %5138 = vmatmul.mubr.msk.f32.gmra.mrb[62].mxu0 %vm303_vm0, %v5933_v21 }
 0x10b   : > { %5140 = vmatprep.mubr.msk.f32.mxu0 %vm303_vm0, %v3024_v57 }
 0x10e   : > { %5141 = vmatmul.mubr.msk.f32.gmra.mrb[64].mxu0 %vm303_vm0, %v3025_v58 }
 0x10f   : > { %5143 = vmatprep.mubr.msk.f32.mxu0 %vm303_vm0, %v3026_v59 }
 0x112   : > { %5144 = vmatmul.mubr.msk.f32.gmra.mrb[66].mxu0 %vm303_vm0, %v3027_v60 }
 0x113   : > { %5146 = vmatprep.mubr.msk.f32.mxu0 %vm303_vm0, %v3028_v61 }
 0x116   : > { %5147 = vmatmul.mubr.msk.f32.gmra.mrb[68].mxu0 %vm303_vm0, %v3029_v62 }
 0x117   : > { %5188 = vmatprep.mubr.msk.f32.mxu0 %vm303_vm0, %v6062_v63 }
 0x11a   : > { %5189 = vmatmul.mubr.msk.f32.vlgmr.msra.gmra.mrb[70].mxu0 %vm303_vm0, %v6067_v0 }
 0x161   : > { %v4812_v1 = vpop.f32.mrb[0].mxu0 }
 0x162   : > { %v400_v2 = vpop.f32.mrb[1].mxu0 }
 0x163   : > { %v5202_v3 = vpack.c.bf16 %v4812_v1, %v400_v2 }
 0x165   : > { %v4815_v4 = vpop.f32.mrb[2].mxu0  ;;  %5203 = vmatprep.subr.bf16.mxu1 %v5202_v3 }
 0x166   : > { %v410_v5 = vpop.f32.mrb[3].mxu0  ;;  %5205 = vmatpush3.bf16.msra.mxu1 %v5202_v3 }
 0x167   : > { %v5206_v7 = vpack.c.bf16 %v4815_v4, %v410_v5 }
 0x169   : > { %v4818_v8 = vpop.f32.mrb[4].mxu0  ;;  %4830 = vmatmul.mubr.msk.f32.vlgmr.msra.gmra.mrb[0].mxu1 %vm303_vm0, %v300_v6  ;;  %5207 = vmatprep.subr.bf16.mxu1 %v5206_v7 }
 0x16a   : > { %v420_v9 = vpop.f32.mrb[5].mxu0  ;;  %5209 = vmatpush3.bf16.msra.mxu1 %v5206_v7  ;;  %4836 = vmatprep.mubr.msk.f32.mxu1 %vm303_vm0, %v6013_v56 }
 0x16b   : > { %v5210_v10 = vpack.c.bf16 %v4818_v8, %v420_v9  ;;  %v6137_v8 = vld [vmem:[#allocation6 + $0x30] sm:$0xff] }
 0x16d   : > { %v4821_v11 = vpop.f32.mrb[6].mxu0  ;;  %4837 = vmatmul.mubr.msk.f32.vlgmr.msra.gmra.mrb[2].mxu1 %vm303_vm0, %v300_v6  ;;  %5211 = vmatprep.subr.bf16.mxu1 %v5210_v10 }
 0x16e   : > { %v430_v12 = vpop.f32.mrb[7].mxu0  ;;  %5213 = vmatpush3.bf16.msra.mxu1 %v5210_v10  ;;  %4843 = vmatprep.mubr.msk.f32.mxu1 %vm303_vm0, %v6013_v56 }
 0x16f   : > { %v5214_v13 = vpack.c.bf16 %v4821_v11, %v430_v12  ;;  %v6142_v11 = vld [vmem:[#allocation6 + $0x38] sm:$0xff] }
 0x171   : > { %v4824_v14 = vpop.f32.mrb[8].mxu0  ;;  %4844 = vmatmul.mubr.msk.f32.vlgmr.msra.gmra.mrb[4].mxu1 %vm303_vm0, %v300_v6  ;;  %5215 = vmatprep.subr.bf16.mxu1 %v5214_v13 }
 0x172   : > { %v440_v15 = vpop.f32.mrb[9].mxu0  ;;  %5217 = vmatpush3.bf16.msra.mxu1 %v5214_v13  ;;  %4850 = vmatprep.mubr.msk.f32.mxu1 %vm303_vm0, %v6013_v56 }
 0x173   : > { %v5218_v16 = vpack.c.bf16 %v4824_v14, %v440_v15 }
 0x175   : > { %4851 = vmatmul.mubr.msk.f32.vlgmr.msra.gmra.mrb[6].mxu1 %vm303_vm0, %v300_v6  ;;  %5219 = vmatprep.subr.bf16.mxu1 %v5218_v16  ;;  %v4866_v17 = vpop.f32.mrb[10].mxu0 }
 0x176   : > { %5221 = vmatpush3.bf16.msra.mxu1 %v5218_v16  ;;  %v930_v18 = vpop.f32.mrb[11].mxu0  ;;  %4857 = vmatprep.mubr.msk.f32.mxu1 %vm303_vm0, %v6013_v56  ;;  %v1954_v56 = vld [vmem:[#allocation6 + $0x28] sm:$0xff] }
 0x177   : > { %v5226_v19 = vpack.c.bf16 %v4866_v17, %v930_v18 }
 0x179   : > { %4858 = vmatmul.mubr.msk.f32.vlgmr.msra.gmra.mrb[8].mxu1 %vm303_vm0, %v300_v6  ;;  %v4869_v21 = vpop.f32.mrb[12].mxu0  ;;  %5227 = vmatprep.subr.bf16.mxu1 %v5226_v19 }
 0x17a   : > { %v940_v22 = vpop.f32.mrb[13].mxu0  ;;  %5229 = vmatpush3.bf16.msra.mxu1 %v5226_v19  ;;  %4883 = vmatprep.mubr.msk.f32.mxu1 %vm303_vm0, %v6083_v20 }
 0x17b   : > { %v5230_v24 = vpack.c.bf16 %v4869_v21, %v940_v22 }
 0x17d   : > { %v4872_v25 = vpop.f32.mrb[14].mxu0  ;;  %4884 = vmatmul.mubr.msk.f32.vlgmr.msra.gmra.mrb[10].mxu1 %vm303_vm0, %v6088_v23  ;;  %5231 = vmatprep.subr.bf16.mxu1 %v5230_v24 }
 0x17e   : > { %v950_v26 = vpop.f32.mrb[15].mxu0  ;;  %5233 = vmatpush3.bf16.msra.mxu1 %v5230_v24  ;;  %4890 = vmatprep.mubr.msk.f32.mxu1 %vm303_vm0, %v6083_v20 }
 0x17f   : > { %v5234_v27 = vpack.c.bf16 %v4872_v25, %v950_v26 }
 0x181   : > { %v4875_v28 = vpop.f32.mrb[16].mxu0  ;;  %4891 = vmatmul.mubr.msk.f32.vlgmr.msra.gmra.mrb[12].mxu1 %vm303_vm0, %v6088_v23  ;;  %5235 = vmatprep.subr.bf16.mxu1 %v5234_v27 }
 0x182   : > { %v960_v29 = vpop.f32.mrb[17].mxu0  ;;  %5237 = vmatpush3.bf16.msra.mxu1 %v5234_v27  ;;  %4897 = vmatprep.mubr.msk.f32.mxu1 %vm303_vm0, %v6083_v20 }
 0x183   : > { %v5238_v30 = vpack.c.bf16 %v4875_v28, %v960_v29 }
 0x185   : > { %v4878_v31 = vpop.f32.mrb[18].mxu0  ;;  %4898 = vmatmul.mubr.msk.f32.vlgmr.msra.gmra.mrb[14].mxu1 %vm303_vm0, %v6088_v23  ;;  %5239 = vmatprep.subr.bf16.mxu1 %v5238_v30 }
 0x186   : > { %v970_v32 = vpop.f32.mrb[19].mxu0  ;;  %5241 = vmatpush3.bf16.msra.mxu1 %v5238_v30  ;;  %4904 = vmatprep.mubr.msk.f32.mxu1 %vm303_vm0, %v6083_v20 }
 0x187   : > { %v5242_v33 = vpack.c.bf16 %v4878_v31, %v970_v32 }
 0x189   : > { %4905 = vmatmul.mubr.msk.f32.vlgmr.msra.gmra.mrb[16].mxu1 %vm303_vm0, %v6088_v23  ;;  %5243 = vmatprep.subr.bf16.mxu1 %v5242_v33  ;;  %v4920_v34 = vpop.f32.mrb[20].mxu0 }
 0x18a   : > { %5245 = vmatpush3.bf16.msra.mxu1 %v5242_v33  ;;  %v1502_v35 = vpop.f32.mrb[21].mxu0  ;;  %4911 = vmatprep.mubr.msk.f32.mxu1 %vm303_vm0, %v6083_v20 }
 0x18b   : > { %v5250_v36 = vpack.c.bf16 %v4920_v34, %v1502_v35 }
 0x18d   : > { %4912 = vmatmul.mubr.msk.f32.vlgmr.msra.gmra.mrb[18].mxu1 %vm303_vm0, %v6088_v23  ;;  %v4923_v37 = vpop.f32.mrb[22].mxu0  ;;  %5251 = vmatprep.subr.bf16.mxu1 %v5250_v36 }
 0x18e   : > { %v1512_v38 = vpop.f32.mrb[23].mxu0  ;;  %5253 = vmatpush3.bf16.msra.mxu1 %v5250_v36  ;;  %4937 = vmatprep.mubr.msk.f32.mxu1 %vm303_vm0, %v6083_v20 }
 0x18f   : > { %v5254_v39 = vpack.c.bf16 %v4923_v37, %v1512_v38 }
 0x191   : > { %v4926_v40 = vpop.f32.mrb[24].mxu0  ;;  %4938 = vmatmul.mubr.msk.f32.vlgmr.msra.gmra.mrb[20].mxu1 %vm303_vm0, %v6088_v23  ;;  %5255 = vmatprep.subr.bf16.mxu1 %v5254_v39 }
 0x192   : > { %v1522_v41 = vpop.f32.mrb[25].mxu0  ;;  %5257 = vmatpush3.bf16.msra.mxu1 %v5254_v39  ;;  %4944 = vmatprep.mubr.msk.f32.mxu1 %vm303_vm0, %v6083_v20 }
 0x193   : > { %v5258_v42 = vpack.c.bf16 %v4926_v40, %v1522_v41 }
 0x195   : > { %v4929_v43 = vpop.f32.mrb[26].mxu0  ;;  %4945 = vmatmul.mubr.msk.f32.vlgmr.msra.gmra.mrb[22].mxu1 %vm303_vm0, %v6088_v23  ;;  %5259 = vmatprep.subr.bf16.mxu1 %v5258_v42 }
 0x196   : > { %v1532_v44 = vpop.f32.mrb[27].mxu0  ;;  %5261 = vmatpush3.bf16.msra.mxu1 %v5258_v42  ;;  %4951 = vmatprep.mubr.msk.f32.mxu1 %vm303_vm0, %v6083_v20 }
 0x197   : > { %v5262_v45 = vpack.c.bf16 %v4929_v43, %v1532_v44 }
 0x199   : > { %v4932_v46 = vpop.f32.mrb[28].mxu0  ;;  %4952 = vmatmul.mubr.msk.f32.vlgmr.msra.gmra.mrb[24].mxu1 %vm303_vm0, %v6088_v23  ;;  %5263 = vmatprep.subr.bf16.mxu1 %v5262_v45 }
 0x19a   : > { %v1542_v47 = vpop.f32.mrb[29].mxu0  ;;  %5265 = vmatpush3.bf16.msra.mxu1 %v5262_v45  ;;  %4958 = vmatprep.mubr.msk.f32.mxu1 %vm303_vm0, %v6083_v20 }
 0x19b   : > { %v5266_v48 = vpack.c.bf16 %v4932_v46, %v1542_v47 }
 0x19d   : > { %4959 = vmatmul.mubr.msk.f32.vlgmr.msra.gmra.mrb[26].mxu1 %vm303_vm0, %v6088_v23  ;;  %5267 = vmatprep.subr.bf16.mxu1 %v5266_v48  ;;  %v4974_v49 = vpop.f32.mrb[30].mxu0 }
 0x19e   : > { %5269 = vmatpush3.bf16.msra.mxu1 %v5266_v48  ;;  %v2024_v50 = vpop.f32.mrb[31].mxu0  ;;  %4965 = vmatprep.mubr.msk.f32.mxu1 %vm303_vm0, %v6083_v20 }
 0x19f   : > { %v5274_v51 = vpack.c.bf16 %v4974_v49, %v2024_v50 }
 0x1a1   : > { %4966 = vmatmul.mubr.msk.f32.vlgmr.msra.gmra.mrb[28].mxu1 %vm303_vm0, %v6088_v23  ;;  %v4977_v53 = vpop.f32.mrb[32].mxu0  ;;  %5275 = vmatprep.subr.bf16.mxu1 %v5274_v51 }
 0x1a2   : > { %v2034_v54 = vpop.f32.mrb[33].mxu0  ;;  %5277 = vmatpush3.bf16.msra.mxu1 %v5274_v51  ;;  %4991 = vmatprep.mubr.msk.f32.mxu1 %vm303_vm0, %v1953_v52 }
 0x1a3   : > { %v5278_v57 = vpack.c.bf16 %v4977_v53, %v2034_v54 }
 0x1a5   : > { %v4980_v58 = vpop.f32.mrb[34].mxu0  ;;  %4992 = vmatmul.mubr.msk.f32.vlgmr.msra.gmra.mrb[30].mxu1 %vm303_vm0, %v1954_v56  ;;  %5279 = vmatprep.subr.bf16.mxu1 %v5278_v57 }
 0x1a6   : > { %v2044_v59 = vpop.f32.mrb[35].mxu0  ;;  %5281 = vmatpush3.bf16.msra.mxu1 %v5278_v57  ;;  %4998 = vmatprep.mubr.msk.f32.mxu1 %vm303_vm0, %v1953_v52 }
 0x1a7   : > { %v5282_v60 = vpack.c.bf16 %v4980_v58, %v2044_v59 }
 0x1a9   : > { %v4983_v61 = vpop.f32.mrb[36].mxu0  ;;  %4999 = vmatmul.mubr.msk.f32.vlgmr.msra.gmra.mrb[32].mxu1 %vm303_vm0, %v1954_v56  ;;  %5283 = vmatprep.subr.bf16.mxu1 %v5282_v60 }
 0x1aa   : > { %v2054_v62 = vpop.f32.mrb[37].mxu0  ;;  %5285 = vmatpush3.bf16.msra.mxu1 %v5282_v60  ;;  %5005 = vmatprep.mubr.msk.f32.mxu1 %vm303_vm0, %v1953_v52 }
 0x1ab   : > { %v5286_v1 = vpack.c.bf16 %v4983_v61, %v2054_v62 }
 0x1ad   : > { %v4986_v2 = vpop.f32.mrb[38].mxu0  ;;  %5006 = vmatmul.mubr.msk.f32.vlgmr.msra.gmra.mrb[34].mxu1 %vm303_vm0, %v1954_v56  ;;  %5287 = vmatprep.subr.bf16.mxu1 %v5286_v1 }
 0x1ae   : > { %v2064_v3 = vpop.f32.mrb[39].mxu0  ;;  %5289 = vmatpush3.bf16.msra.mxu1 %v5286_v1  ;;  %5012 = vmatprep.mubr.msk.f32.mxu1 %vm303_vm0, %v1953_v52 }
 0x1af   : > { %v5290_v4 = vpack.c.bf16 %v4986_v2, %v2064_v3 }
 0x1b1   : > { %5013 = vmatmul.mubr.msk.f32.vlgmr.msra.gmra.mrb[36].mxu1 %vm303_vm0, %v1954_v56  ;;  %5291 = vmatprep.subr.bf16.mxu1 %v5290_v4  ;;  %v5028_v5 = vpop.f32.mrb[40].mxu0 }
 0x1b2   : > { %5293 = vmatpush3.bf16.msra.mxu1 %v5290_v4  ;;  %v2556_v6 = vpop.f32.mrb[41].mxu0  ;;  %5019 = vmatprep.mubr.msk.f32.mxu1 %vm303_vm0, %v1953_v52 }
 0x1b3   : > { %v5298_v7 = vpack.c.bf16 %v5028_v5, %v2556_v6 }
 0x1b5   : > { %5020 = vmatmul.mubr.msk.f32.vlgmr.msra.gmra.mrb[38].mxu1 %vm303_vm0, %v1954_v56  ;;  %v5031_v9 = vpop.f32.mrb[42].mxu0  ;;  %5299 = vmatprep.subr.bf16.mxu1 %v5298_v7 }
 0x1b6   : > { %v2566_v10 = vpop.f32.mrb[43].mxu0  ;;  %5301 = vmatpush3.bf16.msra.mxu1 %v5298_v7  ;;  %5045 = vmatprep.mubr.msk.f32.mxu1 %vm303_vm0, %v6137_v8 }
 0x1b7   : > { %v5302_v12 = vpack.c.bf16 %v5031_v9, %v2566_v10 }
 0x1b9   : > { %v5034_v13 = vpop.f32.mrb[44].mxu0  ;;  %5046 = vmatmul.mubr.msk.f32.vlgmr.msra.gmra.mrb[40].mxu1 %vm303_vm0, %v6142_v11  ;;  %5303 = vmatprep.subr.bf16.mxu1 %v5302_v12 }
 0x1ba   : > { %v2576_v14 = vpop.f32.mrb[45].mxu0  ;;  %5305 = vmatpush3.bf16.msra.mxu1 %v5302_v12  ;;  %5052 = vmatprep.mubr.msk.f32.mxu1 %vm303_vm0, %v6137_v8 }
 0x1bb   : > { %v5306_v15 = vpack.c.bf16 %v5034_v13, %v2576_v14 }
 0x1bd   : > { %v5037_v16 = vpop.f32.mrb[46].mxu0  ;;  %5053 = vmatmul.mubr.msk.f32.vlgmr.msra.gmra.mrb[42].mxu1 %vm303_vm0, %v6142_v11  ;;  %5307 = vmatprep.subr.bf16.mxu1 %v5306_v15 }
 0x1be   : > { %v2586_v17 = vpop.f32.mrb[47].mxu0  ;;  %5309 = vmatpush3.bf16.msra.mxu1 %v5306_v15  ;;  %5059 = vmatprep.mubr.msk.f32.mxu1 %vm303_vm0, %v6137_v8 }
 0x1bf   : > { %v5310_v18 = vpack.c.bf16 %v5037_v16, %v2586_v17 }
 0x1c1   : > { %v5040_v19 = vpop.f32.mrb[48].mxu0  ;;  %5060 = vmatmul.mubr.msk.f32.vlgmr.msra.gmra.mrb[44].mxu1 %vm303_vm0, %v6142_v11  ;;  %5311 = vmatprep.subr.bf16.mxu1 %v5310_v18 }
 0x1c2   : > { %v2596_v20 = vpop.f32.mrb[49].mxu0  ;;  %5313 = vmatpush3.bf16.msra.mxu1 %v5310_v18  ;;  %5066 = vmatprep.mubr.msk.f32.mxu1 %vm303_vm0, %v6137_v8 }
 0x1c3   : > { %v5314_v21 = vpack.c.bf16 %v5040_v19, %v2596_v20 }
 0x1c5   : > { %5067 = vmatmul.mubr.msk.f32.vlgmr.msra.gmra.mrb[46].mxu1 %vm303_vm0, %v6142_v11  ;;  %5315 = vmatprep.subr.bf16.mxu1 %v5314_v21  ;;  %v5082_v22 = vpop.f32.mrb[50].mxu0 }
 0x1c6   : > { %5317 = vmatpush3.bf16.msra.mxu1 %v5314_v21  ;;  %v3126_v23 = vpop.f32.mrb[51].mxu0  ;;  %5073 = vmatprep.mubr.msk.f32.mxu1 %vm303_vm0, %v6137_v8 }
 0x1c7   : > { %v5322_v24 = vpack.c.bf16 %v5082_v22, %v3126_v23 }
 0x1c9   : > { %5074 = vmatmul.mubr.msk.f32.vlgmr.msra.gmra.mrb[48].mxu1 %vm303_vm0, %v6142_v11  ;;  %v5085_v25 = vpop.f32.mrb[52].mxu0  ;;  %5323 = vmatprep.subr.bf16.mxu1 %v5322_v24 }
 0x1ca   : > { %v3136_v26 = vpop.f32.mrb[53].mxu0  ;;  %5325 = vmatpush3.bf16.msra.mxu1 %v5322_v24  ;;  %5099 = vmatprep.mubr.msk.f32.mxu1 %vm303_vm0, %v6137_v8 }
 0x1cb   : > { %v5326_v27 = vpack.c.bf16 %v5085_v25, %v3136_v26 }
 0x1cd   : > { %v5088_v28 = vpop.f32.mrb[54].mxu0  ;;  %5100 = vmatmul.mubr.msk.f32.vlgmr.msra.gmra.mrb[50].mxu1 %vm303_vm0, %v6142_v11  ;;  %5327 = vmatprep.subr.bf16.mxu1 %v5326_v27 }
 0x1ce   : > { %v3146_v29 = vpop.f32.mrb[55].mxu0  ;;  %5329 = vmatpush3.bf16.msra.mxu1 %v5326_v27  ;;  %5106 = vmatprep.mubr.msk.f32.mxu1 %vm303_vm0, %v6137_v8 }
 0x1cf   : > { %v5330_v30 = vpack.c.bf16 %v5088_v28, %v3146_v29 }
 0x1d1   : > { %v5091_v31 = vpop.f32.mrb[56].mxu0  ;;  %5107 = vmatmul.mubr.msk.f32.vlgmr.msra.gmra.mrb[52].mxu1 %vm303_vm0, %v6142_v11  ;;  %5331 = vmatprep.subr.bf16.mxu1 %v5330_v30 }
 0x1d2   : > { %v3156_v32 = vpop.f32.mrb[57].mxu0  ;;  %5333 = vmatpush3.bf16.msra.mxu1 %v5330_v30  ;;  %5113 = vmatprep.mubr.msk.f32.mxu1 %vm303_vm0, %v6137_v8 }
 0x1d3   : > { %v5334_v33 = vpack.c.bf16 %v5091_v31, %v3156_v32 }
 0x1d5   : > { %v5094_v34 = vpop.f32.mrb[58].mxu0  ;;  %5114 = vmatmul.mubr.msk.f32.vlgmr.msra.gmra.mrb[54].mxu1 %vm303_vm0, %v6142_v11  ;;  %5335 = vmatprep.subr.bf16.mxu1 %v5334_v33 }
 0x1d6   : > { %v3166_v35 = vpop.f32.mrb[59].mxu0  ;;  %5337 = vmatpush3.bf16.msra.mxu1 %v5334_v33  ;;  %5120 = vmatprep.mubr.msk.f32.mxu1 %vm303_vm0, %v6137_v8 }
 0x1d7   : > { %v5338_v36 = vpack.c.bf16 %v5094_v34, %v3166_v35 }
 0x1d9   : > { %5121 = vmatmul.mubr.msk.f32.vlgmr.msra.gmra.mrb[56].mxu1 %vm303_vm0, %v6142_v11  ;;  %5339 = vmatprep.subr.bf16.mxu1 %v5338_v36  ;;  %v5136_v37 = vpop.f32.mrb[60].mxu0 }
 0x1da   : > { %5341 = vmatpush3.bf16.msra.mxu1 %v5338_v36  ;;  %v3650_v38 = vpop.f32.mrb[61].mxu0  ;;  %5127 = vmatprep.mubr.msk.f32.mxu1 %vm303_vm0, %v6137_v8 }
 0x1db   : > { %v5346_v39 = vpack.c.bf16 %v5136_v37, %v3650_v38 }
 0x1dd   : > { %5128 = vmatmul.mubr.msk.f32.vlgmr.msra.gmra.mrb[58].mxu1 %vm303_vm0, %v6142_v11  ;;  %v5139_v40 = vpop.f32.mrb[62].mxu0  ;;  %5347 = vmatprep.subr.bf16.mxu1 %v5346_v39 }
 0x1de   : > { %v3660_v41 = vpop.f32.mrb[63].mxu0  ;;  %5349 = vmatpush3.bf16.msra.mxu1 %v5346_v39  ;;  %5153 = vmatprep.mubr.msk.f32.mxu1 %vm303_vm0, %v6062_v63 }
 0x1df   : > { %v5350_v42 = vpack.c.bf16 %v5139_v40, %v3660_v41 }
 0x1e1   : > { %v5142_v43 = vpop.f32.mrb[64].mxu0  ;;  %5154 = vmatmul.mubr.msk.f32.vlgmr.msra.gmra.mrb[60].mxu1 %vm303_vm0, %v6067_v0  ;;  %5351 = vmatprep.subr.bf16.mxu1 %v5350_v42 }
 0x1e2   : > { %v3670_v44 = vpop.f32.mrb[65].mxu0  ;;  %5353 = vmatpush3.bf16.msra.mxu1 %v5350_v42  ;;  %5160 = vmatprep.mubr.msk.f32.mxu1 %vm303_vm0, %v6062_v63 }
 0x1e3   : > { %v5354_v45 = vpack.c.bf16 %v5142_v43, %v3670_v44 }
 0x1e5   : > { %v5145_v46 = vpop.f32.mrb[66].mxu0  ;;  %5161 = vmatmul.mubr.msk.f32.vlgmr.msra.gmra.mrb[62].mxu1 %vm303_vm0, %v6067_v0  ;;  %5355 = vmatprep.subr.bf16.mxu1 %v5354_v45 }
 0x1e6   : > { %v3680_v47 = vpop.f32.mrb[67].mxu0  ;;  %5357 = vmatpush3.bf16.msra.mxu1 %v5354_v45  ;;  %5167 = vmatprep.mubr.msk.f32.mxu1 %vm303_vm0, %v6062_v63 }
 0x1e7   : > { %v5358_v48 = vpack.c.bf16 %v5145_v46, %v3680_v47 }
 0x1e9   : > { %v5148_v49 = vpop.f32.mrb[68].mxu0  ;;  %5168 = vmatmul.mubr.msk.f32.vlgmr.msra.gmra.mrb[64].mxu1 %vm303_vm0, %v6067_v0  ;;  %5359 = vmatprep.subr.bf16.mxu1 %v5358_v48 }
 0x1ea   : > { %v3690_v50 = vpop.f32.mrb[69].mxu0  ;;  %5361 = vmatpush3.bf16.msra.mxu1 %v5358_v48  ;;  %5174 = vmatprep.mubr.msk.f32.mxu1 %vm303_vm0, %v6062_v63 }
 0x1eb   : > { %v5362_v51 = vpack.c.bf16 %v5148_v49, %v3690_v50 }
 0x1ed   : > { %5175 = vmatmul.mubr.msk.f32.vlgmr.msra.gmra.mrb[66].mxu1 %vm303_vm0, %v6067_v0  ;;  %5363 = vmatprep.subr.bf16.mxu1 %v5362_v51  ;;  %v5190_v52 = vpop.f32.mrb[70].mxu0 }
 0x1ee   : > { %5365 = vmatpush3.bf16.msra.mxu1 %v5362_v51  ;;  %5181 = vmatprep.mubr.msk.f32.mxu1 %vm303_vm0, %v6062_v63  ;;  %v4192_v53 = vpop.f32.mrb[71].mxu0 }
 0x1ef   : > { %5371 = vmatprep.subr.bf16.mxu1 %v6001_v55 }
 0x1f1   : > { %5182 = vmatmul.mubr.msk.f32.vlgmr.msra.gmra.mrb[68].mxu1 %vm303_vm0, %v6067_v0 }
 0x1f2   : > { %5373 = vmatpush3.bf16.msra.mxu1 %v6001_v55  ;;  %5195 = vmatprep.mubr.msk.f32.mxu1 %vm303_vm0, %v4192_v53 }
 0x1f5   : > { %5196 = vmatmul.mubr.msk.f32.vlgmr.msra.gmra.mrb[70].mxu1 %vm303_vm0, %v5190_v52 }
 0x23c   : > { %v4831_v54 = vpop.f32.mrb[0].mxu1 }
 0x23d   : > { %v521_v56 = vpop.f32.mrb[1].mxu1  ;;  %v831_v61 = vmul.f32 %v4831_v54, %v4831_v54 }
 0x23e   : > { %v830_v63 = vmul.f32 %v521_v56, %v521_v56 }
 0x240   : > { %v4838_v57 = vpop.f32.mrb[2].mxu1 }
 0x241   : > { %v835_v58 = vmul.f32 %v4838_v57, %v4831_v54  ;;  %v596_v59 = vpop.f32.mrb[3].mxu1  ;;  %v833_v4 = vmul.f32 %v4838_v57, %v4838_v57 }
 0x242   : > { %v834_v60 = vmul.f32 %v596_v59, %v521_v56  ;;  %v832_v0 = vmul.f32 %v596_v59, %v596_v59 }
 0x244   : > { %v4845_v62 = vpop.f32.mrb[4].mxu1 }
 0x245   : > { %v837_v1 = vsub.f32 %v4845_v62, %v831_v61  ;;  %v671_v2 = vpop.f32.mrb[5].mxu1 }
 0x246   : > { %v836_v3 = vsub.f32 %v671_v2, %v830_v63 }
 0x248   : > { %v4852_v5 = vpop.f32.mrb[6].mxu1 }
 0x249   : > { %v839_v55 = vsub.f32 %v4852_v5, %v833_v4  ;;  %v746_v6 = vpop.f32.mrb[7].mxu1 }
 0x24a   : > { %v838_v7 = vsub.f32 %v746_v6, %v832_v0 }
 0x24b   : > { %v847_v8 = vadd.f32 %v839_v55, %v837_v1 }
 0x24c   : > { %v846_v9 = vadd.f32 %v838_v7, %v836_v3  ;;  %v4859_v10 = vpop.f32.mrb[8].mxu1 }
 0x24d   : > { %v849_v11 = vadd.f32 58.5225, %v847_v8  ;;  %v841_v12 = vsub.f32 %v4859_v10, %v835_v58  ;;  %v821_v13 = vpop.f32.mrb[9].mxu1 }
 0x24e   : > { %v848_v14 = vadd.f32 58.5225, %v846_v9  ;;  %v840_v15 = vsub.f32 %v821_v13, %v834_v60 }
 0x24f   : > { %5448 = vrcp.f32 %v849_v11  ;;  %v843_v18 = vmul.f32 2.0, %v841_v12 }
 0x250   : > { %5450 = vrcp.f32 %v848_v14  ;;  %v4885_v16 = vpop.f32.mrb[10].mxu1  ;;  %v842_v20 = vmul.f32 2.0, %v840_v15 }
 0x251   : > { %v1051_v17 = vpop.f32.mrb[11].mxu1  ;;  %v1361_v24 = vmul.f32 %v4885_v16, %v4885_v16  ;;  %v845_v25 = vadd.f32 58.5225, %v843_v18 }
 0x252   : > { %v1360_v26 = vmul.f32 %v1051_v17, %v1051_v17  ;;  %v844_v29 = vadd.f32 58.5225, %v842_v20 }
 0x254   : > { %v4892_v19 = vpop.f32.mrb[12].mxu1 }
 0x255   : > { %v1365_v21 = vmul.f32 %v4892_v19, %v4885_v16  ;;  %v1126_v22 = vpop.f32.mrb[13].mxu1  ;;  %v1363_v36 = vmul.f32 %v4892_v19, %v4892_v19 }
 0x256   : > { %v1364_v23 = vmul.f32 %v1126_v22, %v1051_v17  ;;  %v1362_v37 = vmul.f32 %v1126_v22, %v1126_v22 }
 0x258   : > { %v4899_v27 = vpop.f32.mrb[14].mxu1 }
 0x259   : > { %v5449_v28 = vpop.eup %5448  ;;  %v1367_v30 = vsub.f32 %v4899_v27, %v1361_v24  ;;  %v1201_v31 = vpop.f32.mrb[15].mxu1 }
 0x25a   : > { %v5451_v32 = vpop.eup %5450  ;;  %v853_v33 = vmul.f32 %v5449_v28, %v845_v25  ;;  %v1366_v34 = vsub.f32 %v1201_v31, %v1360_v26 }
 0x25b   : > { %v852_v35 = vmul.f32 %v5451_v32, %v844_v29 }
 0x25c   : > { %v4906_v38 = vpop.f32.mrb[16].mxu1  ;;  %v855_v60 = vmul.f32 %v853_v33, %v853_v33 }
 0x25d   : > { %v1369_v39 = vsub.f32 %v4906_v38, %v1363_v36  ;;  %v1276_v40 = vpop.f32.mrb[17].mxu1  ;;  %v854_v2 = vmul.f32 %v852_v35, %v852_v35 }
 0x25e   : > { %v1368_v41 = vsub.f32 %v1276_v40, %v1362_v37  ;;  %v857_v9 = vmul.f32 %v855_v60, %v853_v33 }
 0x25f   : > { %v1377_v42 = vadd.f32 %v1369_v39, %v1367_v30  ;;  %v856_v13 = vmul.f32 %v854_v2, %v852_v35 }
 0x260   : > { %v1376_v43 = vadd.f32 %v1368_v41, %v1366_v34  ;;  %v4913_v44 = vpop.f32.mrb[18].mxu1 }
 0x261   : > { %v1379_v45 = vadd.f32 58.5225, %v1377_v42  ;;  %v1371_v46 = vsub.f32 %v4913_v44, %v1365_v21  ;;  %v1351_v47 = vpop.f32.mrb[19].mxu1 }
 0x262   : > { %v1378_v48 = vadd.f32 58.5225, %v1376_v43  ;;  %v1370_v49 = vsub.f32 %v1351_v47, %v1364_v23 }
 0x263   : > { %5452 = vrcp.f32 %v1379_v45  ;;  %v1373_v52 = vmul.f32 2.0, %v1371_v46 }
 0x264   : > { %5454 = vrcp.f32 %v1378_v48  ;;  %v4939_v50 = vpop.f32.mrb[20].mxu1  ;;  %v1372_v54 = vmul.f32 2.0, %v1370_v49 }
 0x265   : > { %v1617_v51 = vpop.f32.mrb[21].mxu1  ;;  %v1927_v59 = vmul.f32 %v4939_v50, %v4939_v50  ;;  %v1375_v61 = vadd.f32 58.5225, %v1373_v52 }
 0x266   : > { %v1926_v63 = vmul.f32 %v1617_v51, %v1617_v51  ;;  %v1374_v3 = vadd.f32 58.5225, %v1372_v54 }
 0x268   : > { %v4946_v53 = vpop.f32.mrb[22].mxu1 }
 0x269   : > { %v1931_v56 = vmul.f32 %v4946_v53, %v4939_v50  ;;  %v1692_v57 = vpop.f32.mrb[23].mxu1  ;;  %v1929_v8 = vmul.f32 %v4946_v53, %v4946_v53 }
 0x26a   : > { %v1930_v58 = vmul.f32 %v1692_v57, %v1617_v51  ;;  %v1928_v11 = vmul.f32 %v1692_v57, %v1692_v57 }
 0x26c   : > { %v4953_v62 = vpop.f32.mrb[24].mxu1 }
 0x26d   : > { %v5453_v1 = vpop.eup %5452  ;;  %v1933_v4 = vsub.f32 %v4953_v62, %v1927_v59  ;;  %v1767_v0 = vpop.f32.mrb[25].mxu1 }
 0x26e   : > { %v5455_v5 = vpop.eup %5454  ;;  %v1383_v55 = vmul.f32 %v5453_v1, %v1375_v61  ;;  %v1932_v6 = vsub.f32 %v1767_v0, %v1926_v63 }
 0x26f   : > { %v1382_v7 = vmul.f32 %v5455_v5, %v1374_v3 }
 0x270   : > { %v1385_v10 = vmul.f32 %v1383_v55, %v1383_v55  ;;  %v4960_v12 = vpop.f32.mrb[26].mxu1 }
 0x271   : > { %v1384_v14 = vmul.f32 %v1382_v7, %v1382_v7  ;;  %v1935_v15 = vsub.f32 %v4960_v12, %v1929_v8  ;;  %v1842_v16 = vpop.f32.mrb[27].mxu1 }
 0x272   : > { %v1387_v17 = vmul.f32 %v1385_v10, %v857_v9  ;;  %v1934_v18 = vsub.f32 %v1842_v16, %v1928_v11 }
 0x273   : > { %v1386_v19 = vmul.f32 %v1384_v14, %v856_v13  ;;  %v1943_v20 = vadd.f32 %v1935_v15, %v1933_v4 }
 0x274   : > { %v1942_v21 = vadd.f32 %v1934_v18, %v1932_v6  ;;  %v4967_v22 = vpop.f32.mrb[28].mxu1 }
 0x275   : > { %v1945_v23 = vadd.f32 58.5225, %v1943_v20  ;;  %v1937_v24 = vsub.f32 %v4967_v22, %v1931_v56  ;;  %v1917_v25 = vpop.f32.mrb[29].mxu1 }
 0x276   : > { %v1944_v26 = vadd.f32 58.5225, %v1942_v21  ;;  %v1936_v27 = vsub.f32 %v1917_v25, %v1930_v58 }
 0x277   : > { %5456 = vrcp.f32 %v1945_v23  ;;  %v1939_v30 = vmul.f32 2.0, %v1937_v24 }
 0x278   : > { %5458 = vrcp.f32 %v1944_v26  ;;  %v4993_v28 = vpop.f32.mrb[30].mxu1  ;;  %v1938_v32 = vmul.f32 2.0, %v1936_v27 }
 0x279   : > { %v2145_v29 = vpop.f32.mrb[31].mxu1  ;;  %v2455_v36 = vmul.f32 %v4993_v28, %v4993_v28  ;;  %v1941_v37 = vadd.f32 58.5225, %v1939_v30 }
 0x27a   : > { %v2454_v38 = vmul.f32 %v2145_v29, %v2145_v29  ;;  %v1940_v41 = vadd.f32 58.5225, %v1938_v32 }
 0x27c   : > { %v5000_v31 = vpop.f32.mrb[32].mxu1 }
 0x27d   : > { %v2459_v33 = vmul.f32 %v5000_v31, %v4993_v28  ;;  %v2220_v34 = vpop.f32.mrb[33].mxu1  ;;  %v2457_v48 = vmul.f32 %v5000_v31, %v5000_v31 }
 0x27e   : > { %v2458_v35 = vmul.f32 %v2220_v34, %v2145_v29  ;;  %v2456_v50 = vmul.f32 %v2220_v34, %v2220_v34 }
 0x280   : > { %v5007_v39 = vpop.f32.mrb[34].mxu1 }
 0x281   : > { %v5457_v40 = vpop.eup %5456  ;;  %v2461_v42 = vsub.f32 %v5007_v39, %v2455_v36  ;;  %v2295_v43 = vpop.f32.mrb[35].mxu1 }
 0x282   : > { %v5459_v44 = vpop.eup %5458  ;;  %v1949_v45 = vmul.f32 %v5457_v40, %v1941_v37  ;;  %v2460_v46 = vsub.f32 %v2295_v43, %v2454_v38 }
 0x283   : > { %v1948_v47 = vmul.f32 %v5459_v44, %v1940_v41 }
 0x284   : > { %v1951_v49 = vmul.f32 %v1949_v45, %v1387_v17  ;;  %v5014_v51 = vpop.f32.mrb[36].mxu1 }
 0x285   : > { %v1950_v52 = vmul.f32 %v1948_v47, %v1386_v19  ;;  %v2463_v53 = vsub.f32 %v5014_v51, %v2457_v48  ;;  %v2370_v54 = vpop.f32.mrb[37].mxu1 }
 0x286   : > { %v2462_v56 = vsub.f32 %v2370_v54, %v2456_v50 }
 0x287   : > { %v2471_v57 = vadd.f32 %v2463_v53, %v2461_v42 }
 0x288   : > { %v2470_v58 = vadd.f32 %v2462_v56, %v2460_v46  ;;  %v5021_v59 = vpop.f32.mrb[38].mxu1 }
 0x289   : > { %v2473_v60 = vadd.f32 58.5225, %v2471_v57  ;;  %v2465_v61 = vsub.f32 %v5021_v59, %v2459_v33  ;;  %v2445_v63 = vpop.f32.mrb[39].mxu1 }
 0x28a   : > { %v2472_v62 = vadd.f32 58.5225, %v2470_v58  ;;  %v2464_v1 = vsub.f32 %v2445_v63, %v2458_v35 }
 0x28b   : > { %5460 = vrcp.f32 %v2473_v60  ;;  %v2467_v4 = vmul.f32 2.0, %v2465_v61 }
 0x28c   : > { %5462 = vrcp.f32 %v2472_v62  ;;  %v5047_v2 = vpop.f32.mrb[40].mxu1  ;;  %v2466_v5 = vmul.f32 2.0, %v2464_v1 }
 0x28d   : > { %v2677_v3 = vpop.f32.mrb[41].mxu1  ;;  %v2987_v8 = vmul.f32 %v5047_v2, %v5047_v2  ;;  %v2469_v9 = vadd.f32 58.5225, %v2467_v4 }
 0x28e   : > { %v2986_v10 = vmul.f32 %v2677_v3, %v2677_v3  ;;  %v2468_v13 = vadd.f32 58.5225, %v2466_v5 }
 0x290   : > { %v5054_v0 = vpop.f32.mrb[42].mxu1 }
 0x291   : > { %v2991_v55 = vmul.f32 %v5054_v0, %v5047_v2  ;;  %v2752_v6 = vpop.f32.mrb[43].mxu1  ;;  %v2989_v20 = vmul.f32 %v5054_v0, %v5054_v0 }
 0x292   : > { %v2990_v7 = vmul.f32 %v2752_v6, %v2677_v3  ;;  %v2988_v22 = vmul.f32 %v2752_v6, %v2752_v6 }
 0x294   : > { %v5061_v11 = vpop.f32.mrb[44].mxu1 }
 0x295   : > { %v5461_v12 = vpop.eup %5460  ;;  %v2993_v14 = vsub.f32 %v5061_v11, %v2987_v8  ;;  %v2827_v15 = vpop.f32.mrb[45].mxu1 }
 0x296   : > { %v5463_v16 = vpop.eup %5462  ;;  %v2477_v17 = vmul.f32 %v5461_v12, %v2469_v9  ;;  %v2992_v18 = vsub.f32 %v2827_v15, %v2986_v10 }
 0x297   : > { %v2476_v19 = vmul.f32 %v5463_v16, %v2468_v13 }
 0x298   : > { %v2479_v21 = vmul.f32 %v2477_v17, %v2477_v17  ;;  %v5068_v23 = vpop.f32.mrb[46].mxu1 }
 0x299   : > { %v2478_v24 = vmul.f32 %v2476_v19, %v2476_v19  ;;  %v2995_v25 = vsub.f32 %v5068_v23, %v2989_v20  ;;  %v2902_v26 = vpop.f32.mrb[47].mxu1 }
 0x29a   : > { %v2481_v27 = vmul.f32 %v2479_v21, %v2477_v17  ;;  %v2994_v28 = vsub.f32 %v2902_v26, %v2988_v22 }
 0x29b   : > { %v2480_v29 = vmul.f32 %v2478_v24, %v2476_v19  ;;  %v3003_v30 = vadd.f32 %v2995_v25, %v2993_v14 }
 0x29c   : > { %v3002_v31 = vadd.f32 %v2994_v28, %v2992_v18  ;;  %v2483_v32 = vmul.f32 %v2481_v27, %v1951_v49  ;;  %v5075_v33 = vpop.f32.mrb[48].mxu1 }
 0x29d   : > { %v3005_v34 = vadd.f32 58.5225, %v3003_v30  ;;  %v2997_v35 = vsub.f32 %v5075_v33, %v2991_v55  ;;  %v2482_v36 = vmul.f32 %v2480_v29, %v1950_v52  ;;  %v2977_v37 = vpop.f32.mrb[49].mxu1 }
 0x29e   : > { %v3004_v38 = vadd.f32 58.5225, %v3002_v31  ;;  %v2996_v39 = vsub.f32 %v2977_v37, %v2990_v7 }
 0x29f   : > { %5464 = vrcp.f32 %v3005_v34  ;;  %v2999_v42 = vmul.f32 2.0, %v2997_v35 }
 0x2a0   : > { %5466 = vrcp.f32 %v3004_v38  ;;  %v5101_v40 = vpop.f32.mrb[50].mxu1  ;;  %v2998_v44 = vmul.f32 2.0, %v2996_v39 }
 0x2a1   : > { %v3241_v41 = vpop.f32.mrb[51].mxu1  ;;  %v3551_v48 = vmul.f32 %v5101_v40, %v5101_v40  ;;  %v3001_v50 = vadd.f32 58.5225, %v2999_v42 }
 0x2a2   : > { %v3550_v49 = vmul.f32 %v3241_v41, %v3241_v41  ;;  %v3000_v54 = vadd.f32 58.5225, %v2998_v44 }
 0x2a4   : > { %v5108_v43 = vpop.f32.mrb[52].mxu1 }
 0x2a5   : > { %v3555_v45 = vmul.f32 %v5108_v43, %v5101_v40  ;;  %v3316_v46 = vpop.f32.mrb[53].mxu1  ;;  %v3553_v61 = vmul.f32 %v5108_v43, %v5108_v43 }
 0x2a6   : > { %v3554_v47 = vmul.f32 %v3316_v46, %v3241_v41  ;;  %v3552_v62 = vmul.f32 %v3316_v46, %v3316_v46 }
 0x2a8   : > { %v5115_v51 = vpop.f32.mrb[54].mxu1 }
 0x2a9   : > { %v5465_v53 = vpop.eup %5464  ;;  %v3557_v52 = vsub.f32 %v5115_v51, %v3551_v48  ;;  %v3391_v56 = vpop.f32.mrb[55].mxu1 }
 0x2aa   : > { %v5467_v57 = vpop.eup %5466  ;;  %v3009_v58 = vmul.f32 %v5465_v53, %v3001_v50  ;;  %v3556_v59 = vsub.f32 %v3391_v56, %v3550_v49 }
 0x2ab   : > { %v3008_v60 = vmul.f32 %v5467_v57, %v3000_v54 }
 0x2ac   : > { %v3011_v63 = vmul.f32 %v3009_v58, %v2483_v32  ;;  %v5122_v1 = vpop.f32.mrb[56].mxu1 }
 0x2ad   : > { %v3010_v2 = vmul.f32 %v3008_v60, %v2482_v36  ;;  %v3559_v3 = vsub.f32 %v5122_v1, %v3553_v61  ;;  %v3466_v4 = vpop.f32.mrb[57].mxu1 }
 0x2ae   : > { %v3558_v0 = vsub.f32 %v3466_v4, %v3552_v62 }
 0x2af   : > { %v3567_v5 = vadd.f32 %v3559_v3, %v3557_v52 }
 0x2b0   : > { %v3566_v55 = vadd.f32 %v3558_v0, %v3556_v59  ;;  %v5129_v6 = vpop.f32.mrb[58].mxu1 }
 0x2b1   : > { %v3569_v7 = vadd.f32 58.5225, %v3567_v5  ;;  %v3561_v8 = vsub.f32 %v5129_v6, %v3555_v45  ;;  %v3541_v9 = vpop.f32.mrb[59].mxu1 }
 0x2b2   : > { %v3568_v10 = vadd.f32 58.5225, %v3566_v55  ;;  %v3560_v11 = vsub.f32 %v3541_v9, %v3554_v47 }
 0x2b3   : > { %5468 = vrcp.f32 %v3569_v7  ;;  %v3563_v14 = vmul.f32 2.0, %v3561_v8 }
 0x2b4   : > { %5470 = vrcp.f32 %v3568_v10  ;;  %v5155_v12 = vpop.f32.mrb[60].mxu1  ;;  %v3562_v16 = vmul.f32 2.0, %v3560_v11 }
 0x2b5   : > { %v3771_v13 = vpop.f32.mrb[61].mxu1  ;;  %v4081_v17 = vmul.f32 %v5155_v12, %v5155_v12  ;;  %v3565_v25 = vadd.f32 58.5225, %v3563_v14 }
 0x2b6   : > { %v4080_v21 = vmul.f32 %v3771_v13, %v3771_v13  ;;  %v3564_v29 = vadd.f32 58.5225, %v3562_v16 }
 0x2b8   : > { %v5162_v15 = vpop.f32.mrb[62].mxu1 }
 0x2b9   : > { %v4083_v18 = vmul.f32 %v5162_v15, %v5162_v15  ;;  %v4085_v19 = vmul.f32 %v5162_v15, %v5155_v12  ;;  %v3846_v20 = vpop.f32.mrb[63].mxu1 }
 0x2ba   : > { %v4082_v22 = vmul.f32 %v3846_v20, %v3846_v20  ;;  %v4084_v23 = vmul.f32 %v3846_v20, %v3771_v13 }
 0x2bb   : > { %v4115_v24 = vadd.f32 %v4083_v18, %v4081_v17  ;;  %v4111_v47 = vmul.f32 2.0, %v4085_v19 }
 0x2bc   : > { %v4114_v26 = vadd.f32 %v4082_v22, %v4080_v21  ;;  %v5169_v27 = vpop.f32.mrb[64].mxu1  ;;  %v4110_v49 = vmul.f32 2.0, %v4084_v23 }
 0x2bd   : > { %v5469_v28 = vpop.eup %5468  ;;  %v4117_v30 = vadd.f32 6.5025, %v4115_v24  ;;  %v4087_v31 = vsub.f32 %v5169_v27, %v4081_v17  ;;  %v3921_v32 = vpop.f32.mrb[65].mxu1  ;;  %v4113_v57 = vadd.f32 6.5025, %v4111_v47 }
 0x2be   : > { %v5471_v33 = vpop.eup %5470  ;;  %v3573_v34 = vmul.f32 %v5469_v28, %v3565_v25  ;;  %v4116_v35 = vadd.f32 6.5025, %v4114_v26  ;;  %v4086_v36 = vsub.f32 %v3921_v32, %v4080_v21  ;;  %v4112_v60 = vadd.f32 6.5025, %v4110_v49 }
 0x2bf   : > { %v3572_v37 = vmul.f32 %v5471_v33, %v3564_v29  ;;  %5472 = vrcp.f32 %v4117_v30 }
 0x2c0   : > { %v3575_v38 = vmul.f32 %v3573_v34, %v3573_v34  ;;  %5474 = vrcp.f32 %v4116_v35  ;;  %v5176_v39 = vpop.f32.mrb[66].mxu1 }
 0x2c1   : > { %v3574_v40 = vmul.f32 %v3572_v37, %v3572_v37  ;;  %v4089_v41 = vsub.f32 %v5176_v39, %v4083_v18  ;;  %v3996_v42 = vpop.f32.mrb[67].mxu1 }
 0x2c2   : > { %v3577_v43 = vmul.f32 %v3575_v38, %v3011_v63  ;;  %v4088_v44 = vsub.f32 %v3996_v42, %v4082_v22 }
 0x2c3   : > { %v3576_v45 = vmul.f32 %v3574_v40, %v3010_v2  ;;  %v4097_v46 = vadd.f32 %v4089_v41, %v4087_v31 }
 0x2c4   : > { %v4096_v48 = vadd.f32 %v4088_v44, %v4086_v36  ;;  %v5183_v50 = vpop.f32.mrb[68].mxu1 }
 0x2c5   : > { %v4099_v51 = vadd.f32 58.5225, %v4097_v46  ;;  %v4091_v53 = vsub.f32 %v5183_v50, %v4085_v19  ;;  %v4071_v54 = vpop.f32.mrb[69].mxu1 }
 0x2c6   : > { %v4098_v52 = vadd.f32 58.5225, %v4096_v48  ;;  %v4090_v56 = vsub.f32 %v4071_v54, %v4084_v23 }
 0x2c7   : > { %5476 = vrcp.f32 %v4099_v51  ;;  %v4093_v2 = vmul.f32 2.0, %v4091_v53 }
 0x2c8   : > { %5478 = vrcp.f32 %v4098_v52  ;;  %v5197_v58 = vpop.f32.mrb[70].mxu1  ;;  %v4092_v3 = vmul.f32 2.0, %v4090_v56 }
 0x2c9   : > { %v5473_v59 = vpop.eup %5472  ;;  %v4273_v61 = vpop.f32.mrb[71].mxu1  ;;  %v4095_v4 = vadd.f32 58.5225, %v4093_v2  ;;  %v4289_v23 = vmul.f32 0.041830067, %v5197_v58 }
 0x2ca   : > { %v5475_v63 = vpop.eup %5474  ;;  %v4121_v62 = vmul.f32 %v5473_v59, %v4113_v57  ;;  %v4094_v5 = vadd.f32 58.5225, %v4092_v3  ;;  %v4288_v25 = vmul.f32 0.041830067, %v4273_v61 }
 0x2cb   : > { %v4120_v1 = vmul.f32 %v5475_v63, %v4112_v60 }
 0x2cc   : > { %v4123_v8 = vmul.f32 %v4121_v62, %v4121_v62 }
 0x2cd   : > { %v4122_v10 = vmul.f32 %v4120_v1, %v4120_v1 }
 0x2ce   : > { %v4125_v15 = vmul.f32 %v4123_v8, %v4121_v62 }
 0x2cf   : > { %v4124_v17 = vmul.f32 %v4122_v10, %v4120_v1 }
 0x2d1   : > { %v5477_v0 = vpop.eup %5476 }
 0x2d2   : > { %v5479_v55 = vpop.eup %5478  ;;  %v4103_v6 = vmul.f32 %v5477_v0, %v4095_v4 }
 0x2d3   : > { %v4102_v7 = vmul.f32 %v5479_v55, %v4094_v5 }
 0x2d4   : > { %v4105_v9 = vmul.f32 %v4103_v6, %v4103_v6 }
 0x2d5   : > { %v4104_v11 = vmul.f32 %v4102_v7, %v4102_v7 }
 0x2d6   : > { %v4107_v12 = vmul.f32 %v4105_v9, %v4103_v6 }
 0x2d7   : > { %v4106_v13 = vmul.f32 %v4104_v11, %v4102_v7 }
 0x2d8   : > { %v4109_v14 = vmul.f32 %v4107_v12, %v3577_v43 }
 0x2d9   : > { %v4108_v16 = vmul.f32 %v4106_v13, %v3576_v45 }
 0x2da   : > { %v4283_v18 = vmul.f32 %v4125_v15, %v4109_v14 }
 0x2db   : > { %v4282_v19 = vmul.f32 %v4124_v17, %v4108_v16 }
 0x2dc   : > { %v4285_v20 = vsub.f32 1.0, %v4283_v18 }
 0x2dd   : > { %v4284_v21 = vsub.f32 1.0, %v4282_v19 }
 0x2de   : > { %v4287_v22 = vmul.f32 168.0, %v4285_v20 }
 0x2df   : > { %v4286_v24 = vmul.f32 168.0, %v4284_v21 }
 0x2e0   : > { %v4291_v26 = vadd.f32 %v4289_v23, %v4287_v22 }
 0x2e1   : > { %v4290_v27 = vadd.f32 %v4288_v25, %v4286_v24 }
 0x2e2   : > { %v4293_v28 = vsel %vm303_vm0, %v4291_v26, 0.0 }
 0x2e3   : > { %v4292_v29 = vsel %vm303_vm0, %v4290_v27, 0.0 }
 0x2e4   : > { %v4294_v30 = vadd.f32 %v4293_v28, %v4292_v29 }
 0x2e6   : > { %4295 = vadd.xlane.f32.xlu0 %v4294_v30 }
 0x373   : > { %v4296_v31 = vpop.xlane.xlu0 %4295 }
 0x374   : > { %v4297_v32 = vrot.slane %v4296_v31, 4 }
 0x376   : > { %v4298_v33 = vadd.f32 %v4297_v32, %v4296_v31 }
 0x378   : > { %v4299_v34 = vrot.slane %v4298_v33, 2 }
 0x37a   : > { %v4300_v35 = vadd.f32 %v4299_v34, %v4298_v33 }
 0x37c   : > { %v4301_v36 = vrot.slane %v4300_v35, 1 }
 0x37e   : > { %v4302_v37 = vadd.f32 %v4301_v36, %v4300_v35 }
 0x380   : > { %5379 = vpush %v4302_v37 }
 0x3b1   : > { %s5380_s20 = spop %5379 }
 0x3b2   : > { %v4304_v38 = vstv %s5380_s20 }
 0x3b3   : > { %v4306_v39 = vmul.f32 0.00390625, %v4304_v38 }
 0x3b5   : > { %4308 = vst.msk [vmem:[%s282_s5] sm:$0x1] %vm4307_vm1, %v4306_v39 }
 0x3b6 PF: > { %p18_p12 = scmp.ge.s32.totalorder %s5774_s24, 4   ;;  %s6244_s15 = smov %s5634_s16 }
 0x3b7   : > { %s6245_s16 = smov %s5638_s17  ;;  %s6246_s17 = smov %s5785_s8 }
 0x3b8   : > { %s6247_s18 = smov %s5774_s24  ;;  %20 = sbr.rel (!%p18_p12) target bundleno = 6 (0x6), region = 109 }
 0x3bf   :  { %4326 = vsyncpa [#allocation3], 1 }
 0x3c0   :  { %4328 = vsyncpa [#allocation3 + $0x1], 1 }
 0x3c1   :  { %4329 = vsyncpa [#allocation5], 1 }
 0x3c2   :  { %4331 = vsyncpa [#allocation5 + $0x1], 1 }
 0x3c3   :  { %4332 = vsyncpa [#allocation8], 1 }

</bundles_post_ra>
